<compile_context>
chip_gen: v5e
topology: v5e:2x2
jax: 0.10.0
libtpu: 0.0.40
codegen_flags: <defaults>
</compile_context>

<pallas_src>
import functools

import jax
import jax.numpy as jnp
from jax.experimental import pallas as pl
from jax.experimental.pallas import tpu as pltpu

_HID = 64  # hidden width of the network (layers 2..5 are padded to 64x64)


def _silu(x):
    return x * jax.nn.sigmoid(x)


def dnn_kernel(x_ref, w1t_ref, b1c_ref, ws_ref, bs_ref, o_ref):
    """One batch tile of the fused MLP, computed feature-major.

    x_ref   : (batch_tile, F)      bf16
    w1t_ref : (64, F)              bf16   (W1 transposed)
    b1c_ref : (64, 1)              f32
    ws_ref  : (4, 64, 64)          bf16   (W2..W5 transposed, zero-padded)
    bs_ref  : (4, 64, 1)           f32    (b2..b5, zero-padded)
    o_ref   : (out_dim, batch_tile) f32   (batch on the lane axis)
    """
    x = x_ref[...]                                        # (bt, F) bf16

    # h1^T = silu(W1^T @ x^T + b1): contract over F on both operands.
    z = jax.lax.dot_general(
        w1t_ref[...], x, (((1,), (1,)), ((), ())),
        preferred_element_type=jnp.float32)               # (64, bt) f32
    h = _silu(z + b1c_ref[...])

    # Hidden layers 2..4 (SiLU), padded 64x64 weights.
    for l in range(3):
        z = jnp.dot(ws_ref[l], h.astype(ws_ref.dtype),
                    preferred_element_type=jnp.float32)   # (64, bt) f32
        h = _silu(z + bs_ref[l])

    # Output layer (Sigmoid); only the first out_dim rows are meaningful.
    z = jnp.dot(ws_ref[3], h.astype(ws_ref.dtype),
                preferred_element_type=jnp.float32)       # (64, bt) f32
    y = jax.nn.sigmoid(z + bs_ref[3])

    out_dim = o_ref.shape[0]
    o_ref[...] = y[:out_dim, :].astype(o_ref.dtype)       # lane-dense store


def _pad_to(a, shape):
    return jnp.pad(a, [(0, s - d) for d, s in zip(a.shape, shape)])


def prepare_dnn_params(params, compute_dtype=jnp.bfloat16):
    """Transpose, zero-pad and stack the torch-layout params for the kernel."""
    (w1, b1), (w2, b2), (w3, b3), (w4, b4), (w5, b5) = params
    out_dim = w5.shape[1]
    assert out_dim <= _HID, "output width must be <= 64"

    w1t = jnp.asarray(w1, jnp.float32).T.astype(compute_dtype)      # (64, F)
    b1c = jnp.asarray(b1, jnp.float32).reshape(_HID, 1)             # (64, 1)

    def t_pad(w):   # (in, out) -> (out, in), zero-padded to (64, 64)
        return _pad_to(jnp.asarray(w, jnp.float32).T, (_HID, _HID))

    def b_pad(b):   # (1, out) -> (64, 1), zero-padded
        return _pad_to(jnp.asarray(b, jnp.float32).reshape(-1, 1), (_HID, 1))

    ws = jnp.stack([t_pad(w2), t_pad(w3), t_pad(w4), t_pad(w5)]).astype(compute_dtype)
    bs = jnp.stack([b_pad(b2), b_pad(b3), b_pad(b4), b_pad(b5)])
    return w1t, b1c, ws, bs, out_dim


def init_dnn_params(key, input_size, output_size=1):
    """Deterministic init mimicking nn.Linear default (uniform +/- 1/sqrt(fan_in))."""
    dims = [(input_size, 64), (64, 64), (64, 64), (64, 16), (16, output_size)]
    params = []
    for (fan_in, fan_out) in dims:
        key, kw, kb = jax.random.split(key, 3)
        bound = 1.0 / jnp.sqrt(jnp.float32(fan_in))
        w = jax.random.uniform(kw, (fan_in, fan_out), jnp.float32, -bound, bound)
        b = jax.random.uniform(kb, (1, fan_out), jnp.float32, -bound, bound)
        params.append((w, b))
    return params


@functools.partial(jax.jit, static_argnames=("batch_tile",))
def dnn_forward(x, params, batch_tile=256):
    # x: (B, ...) -> flatten trailing dims like torch's reshape(x.shape[0], -1)
    B = x.shape[0]
    x2d = x.reshape(B, -1)
    F = x2d.shape[1]

    w1t, b1c, ws, bs, out_dim = prepare_dnn_params(params)

    num_tiles = pl.cdiv(B, batch_tile)          # arbitrary B via zero-padding
    Bp = num_tiles * batch_tile
    x_p = jnp.pad(x2d.astype(jnp.bfloat16), ((0, Bp - B), (0, 0)))

    out_t = pl.pallas_call(
        dnn_kernel,
        out_shape=jax.ShapeDtypeStruct((out_dim, Bp), jnp.float32),
        grid=(num_tiles,),
        in_specs=[
            pl.BlockSpec((batch_tile, F), lambda i: (i, 0)),    # batch-tiled x
            pl.BlockSpec(w1t.shape, lambda i: (0, 0)),          # resident weights
            pl.BlockSpec(b1c.shape, lambda i: (0, 0)),
            pl.BlockSpec(ws.shape, lambda i: (0, 0, 0)),
            pl.BlockSpec(bs.shape, lambda i: (0, 0, 0)),
        ],
        out_specs=pl.BlockSpec((out_dim, batch_tile), lambda i: (0, i)),
        compiler_params=pltpu.CompilerParams(
            dimension_semantics=("parallel",),
            vmem_limit_bytes=32 * 1024 * 1024),
    )(x_p, w1t, b1c, ws, bs)

    return out_t[:, :B].T                        # (B, out_dim)


def dnn_reference(x, params):
    x2d = x.reshape(x.shape[0], -1).astype(jnp.float32)
    (w1, b1), (w2, b2), (w3, b3), (w4, b4), (w5, b5) = params
    h = jax.nn.silu(x2d @ w1 + b1)
    h = jax.nn.silu(h @ w2 + b2)
    h = jax.nn.silu(h @ w3 + b3)
    h = jax.nn.silu(h @ w4 + b4)
    return jax.nn.sigmoid(h @ w5 + b5)


if __name__ == "__main__":
    key = jax.random.PRNGKey(0)
    k_params, k_x = jax.random.split(key)

    batch = 300          # deliberately NOT a multiple of batch_tile (exercises padding)
    input_size = 32      # tabular feature count (after StandardScaler in the notebook)

    params = init_dnn_params(k_params, input_size, output_size=1)
    x = jax.random.normal(k_x, (batch, input_size), jnp.float32)

    out = dnn_forward(x, params, batch_tile=256)
    out = jax.block_until_ready(out)

    ref = dnn_reference(x, params)
    assert out.shape == (batch, 1)
    max_err = float(jnp.max(jnp.abs(out - ref)))
    # bf16 storage of x / weights -> loosened tolerance vs the f32 reference.
    assert max_err < 2e-2, f"mismatch vs JAX reference (max abs err {max_err})"

    print("KERNEL_OK")
</pallas_src>

<mosaic_0001>
module attributes {stable_mosaic.version = 11 : i64} {
  func.func @dnn_kernel(%arg0: i32, %arg1: memref<256x32xbf16, #tpu.memory_space<vmem>>, %arg2: memref<64x32xbf16, #tpu.memory_space<vmem>>, %arg3: memref<64x1xf32, #tpu.memory_space<vmem>>, %arg4: memref<4x64x64xbf16, #tpu.memory_space<vmem>>, %arg5: memref<4x64x1xf32, #tpu.memory_space<vmem>>, %arg6: memref<1x256xf32, #tpu.memory_space<vmem>>) attributes {dimension_semantics = [#tpu.dimension_semantics<parallel>], iteration_bounds = array<i64: 2>, scalar_prefetch = 0 : i64, scratch_operands = 0 : i64, tpu.core_type = #tpu.core_type<tc>, window_params = [{transform_indices = @transform_0, window_bounds = array<i64: 256, 32>}, {pipeline_mode = #tpu.pipeline_mode<synchronous>, transform_indices = @transform_1, window_bounds = array<i64: 64, 32>}, {pipeline_mode = #tpu.pipeline_mode<synchronous>, transform_indices = @transform_2, window_bounds = array<i64: 64, 1>}, {pipeline_mode = #tpu.pipeline_mode<synchronous>, transform_indices = @transform_3, window_bounds = array<i64: 4, 64, 64>}, {pipeline_mode = #tpu.pipeline_mode<synchronous>, transform_indices = @transform_4, window_bounds = array<i64: 4, 64, 1>}, {transform_indices = @transform_5, window_bounds = array<i64: 1, 256>}]} {
    %c0 = arith.constant 0 : index
    %c0_0 = arith.constant 0 : index
    %0 = vector.load %arg1[%c0, %c0_0] : memref<256x32xbf16, #tpu.memory_space<vmem>>, vector<256x32xbf16>
    %c0_1 = arith.constant 0 : index
    %c0_2 = arith.constant 0 : index
    %1 = vector.load %arg2[%c0_1, %c0_2] : memref<64x32xbf16, #tpu.memory_space<vmem>>, vector<64x32xbf16>
    %cst = arith.constant dense<0.000000e+00> : vector<64x256xf32>
    %2 = tpu.matmul %1, %0, %cst {dimension_numbers = #tpu.dot_dimension_numbers<[1], [1], [0], [0], [0, 0, 1, 0], [], []>} : vector<64x32xbf16>, vector<256x32xbf16>, vector<64x256xf32> -> vector<64x256xf32>
    %c0_3 = arith.constant 0 : index
    %c0_4 = arith.constant 0 : index
    %3 = vector.load %arg3[%c0_3, %c0_4] : memref<64x1xf32, #tpu.memory_space<vmem>>, vector<64x1xf32>
    %4 = vector.broadcast %3 : vector<64x1xf32> to vector<64x256xf32>
    %5 = arith.addf %2, %4 : vector<64x256xf32>
    %6 = arith.negf %5 : vector<64x256xf32>
    %7 = math.exp %6 : vector<64x256xf32>
    %cst_5 = arith.constant 1.000000e+00 : f32
    %8 = vector.broadcast %cst_5 : f32 to vector<64x256xf32>
    %9 = arith.addf %8, %7 : vector<64x256xf32>
    %10 = arith.divf %8, %9 : vector<64x256xf32>
    %11 = arith.mulf %5, %10 : vector<64x256xf32>
    %c0_6 = arith.constant 0 : index
    %c0_7 = arith.constant 0 : index
    %c0_8 = arith.constant 0 : index
    %12 = vector.load %arg4[%c0_6, %c0_7, %c0_8] : memref<4x64x64xbf16, #tpu.memory_space<vmem>>, vector<1x64x64xbf16>
    %13 = vector.shape_cast %12 : vector<1x64x64xbf16> to vector<64x64xbf16>
    %14 = arith.truncf %11 : vector<64x256xf32> to vector<64x256xbf16>
    %cst_9 = arith.constant dense<0.000000e+00> : vector<64x256xf32>
    %15 = tpu.matmul %13, %14, %cst_9 {dimension_numbers = #tpu.dot_dimension_numbers<[1], [0], [0], [1], [0, 0, 1, 1], [], []>} : vector<64x64xbf16>, vector<64x256xbf16>, vector<64x256xf32> -> vector<64x256xf32>
    %c0_10 = arith.constant 0 : index
    %c0_11 = arith.constant 0 : index
    %c0_12 = arith.constant 0 : index
    %16 = vector.load %arg5[%c0_10, %c0_11, %c0_12] : memref<4x64x1xf32, #tpu.memory_space<vmem>>, vector<1x64x1xf32>
    %17 = vector.shape_cast %16 : vector<1x64x1xf32> to vector<64x1xf32>
    %18 = vector.broadcast %17 : vector<64x1xf32> to vector<64x256xf32>
    %19 = arith.addf %15, %18 : vector<64x256xf32>
    %20 = arith.negf %19 : vector<64x256xf32>
    %21 = math.exp %20 : vector<64x256xf32>
    %cst_13 = arith.constant 1.000000e+00 : f32
    %22 = vector.broadcast %cst_13 : f32 to vector<64x256xf32>
    %23 = arith.addf %22, %21 : vector<64x256xf32>
    %24 = arith.divf %22, %23 : vector<64x256xf32>
    %25 = arith.mulf %19, %24 : vector<64x256xf32>
    %c1 = arith.constant 1 : index
    %c0_14 = arith.constant 0 : index
    %c0_15 = arith.constant 0 : index
    %26 = vector.load %arg4[%c1, %c0_14, %c0_15] : memref<4x64x64xbf16, #tpu.memory_space<vmem>>, vector<1x64x64xbf16>
    %27 = vector.shape_cast %26 : vector<1x64x64xbf16> to vector<64x64xbf16>
    %28 = arith.truncf %25 : vector<64x256xf32> to vector<64x256xbf16>
    %cst_16 = arith.constant dense<0.000000e+00> : vector<64x256xf32>
    %29 = tpu.matmul %27, %28, %cst_16 {dimension_numbers = #tpu.dot_dimension_numbers<[1], [0], [0], [1], [0, 0, 1, 1], [], []>} : vector<64x64xbf16>, vector<64x256xbf16>, vector<64x256xf32> -> vector<64x256xf32>
    %c1_17 = arith.constant 1 : index
    %c0_18 = arith.constant 0 : index
    %c0_19 = arith.constant 0 : index
    %30 = vector.load %arg5[%c1_17, %c0_18, %c0_19] : memref<4x64x1xf32, #tpu.memory_space<vmem>>, vector<1x64x1xf32>
    %31 = vector.shape_cast %30 : vector<1x64x1xf32> to vector<64x1xf32>
    %32 = vector.broadcast %31 : vector<64x1xf32> to vector<64x256xf32>
    %33 = arith.addf %29, %32 : vector<64x256xf32>
    %34 = arith.negf %33 : vector<64x256xf32>
    %35 = math.exp %34 : vector<64x256xf32>
    %cst_20 = arith.constant 1.000000e+00 : f32
    %36 = vector.broadcast %cst_20 : f32 to vector<64x256xf32>
    %37 = arith.addf %36, %35 : vector<64x256xf32>
    %38 = arith.divf %36, %37 : vector<64x256xf32>
    %39 = arith.mulf %33, %38 : vector<64x256xf32>
    %c2 = arith.constant 2 : index
    %c0_21 = arith.constant 0 : index
    %c0_22 = arith.constant 0 : index
    %40 = vector.load %arg4[%c2, %c0_21, %c0_22] : memref<4x64x64xbf16, #tpu.memory_space<vmem>>, vector<1x64x64xbf16>
    %41 = vector.shape_cast %40 : vector<1x64x64xbf16> to vector<64x64xbf16>
    %42 = arith.truncf %39 : vector<64x256xf32> to vector<64x256xbf16>
    %cst_23 = arith.constant dense<0.000000e+00> : vector<64x256xf32>
    %43 = tpu.matmul %41, %42, %cst_23 {dimension_numbers = #tpu.dot_dimension_numbers<[1], [0], [0], [1], [0, 0, 1, 1], [], []>} : vector<64x64xbf16>, vector<64x256xbf16>, vector<64x256xf32> -> vector<64x256xf32>
    %c2_24 = arith.constant 2 : index
    %c0_25 = arith.constant 0 : index
    %c0_26 = arith.constant 0 : index
    %44 = vector.load %arg5[%c2_24, %c0_25, %c0_26] : memref<4x64x1xf32, #tpu.memory_space<vmem>>, vector<1x64x1xf32>
    %45 = vector.shape_cast %44 : vector<1x64x1xf32> to vector<64x1xf32>
    %46 = vector.broadcast %45 : vector<64x1xf32> to vector<64x256xf32>
    %47 = arith.addf %43, %46 : vector<64x256xf32>
    %48 = arith.negf %47 : vector<64x256xf32>
    %49 = math.exp %48 : vector<64x256xf32>
    %cst_27 = arith.constant 1.000000e+00 : f32
    %50 = vector.broadcast %cst_27 : f32 to vector<64x256xf32>
    %51 = arith.addf %50, %49 : vector<64x256xf32>
    %52 = arith.divf %50, %51 : vector<64x256xf32>
    %53 = arith.mulf %47, %52 : vector<64x256xf32>
    %c3 = arith.constant 3 : index
    %c0_28 = arith.constant 0 : index
    %c0_29 = arith.constant 0 : index
    %54 = vector.load %arg4[%c3, %c0_28, %c0_29] : memref<4x64x64xbf16, #tpu.memory_space<vmem>>, vector<1x64x64xbf16>
    %55 = vector.shape_cast %54 : vector<1x64x64xbf16> to vector<64x64xbf16>
    %56 = arith.truncf %53 : vector<64x256xf32> to vector<64x256xbf16>
    %cst_30 = arith.constant dense<0.000000e+00> : vector<64x256xf32>
    %57 = tpu.matmul %55, %56, %cst_30 {dimension_numbers = #tpu.dot_dimension_numbers<[1], [0], [0], [1], [0, 0, 1, 1], [], []>} : vector<64x64xbf16>, vector<64x256xbf16>, vector<64x256xf32> -> vector<64x256xf32>
    %c3_31 = arith.constant 3 : index
    %c0_32 = arith.constant 0 : index
    %c0_33 = arith.constant 0 : index
    %58 = vector.load %arg5[%c3_31, %c0_32, %c0_33] : memref<4x64x1xf32, #tpu.memory_space<vmem>>, vector<1x64x1xf32>
    %59 = vector.shape_cast %58 : vector<1x64x1xf32> to vector<64x1xf32>
    %60 = vector.broadcast %59 : vector<64x1xf32> to vector<64x256xf32>
    %61 = arith.addf %57, %60 : vector<64x256xf32>
    %62 = arith.negf %61 : vector<64x256xf32>
    %63 = math.exp %62 : vector<64x256xf32>
    %cst_34 = arith.constant 1.000000e+00 : f32
    %64 = vector.broadcast %cst_34 : f32 to vector<64x256xf32>
    %65 = arith.addf %64, %63 : vector<64x256xf32>
    %66 = arith.divf %64, %65 : vector<64x256xf32>
    %67 = vector.extract_strided_slice %66 {offsets = [0, 0], sizes = [1, 256], strides = [1, 1]} : vector<64x256xf32> to vector<1x256xf32>
    %c0_35 = arith.constant 0 : index
    %c0_36 = arith.constant 0 : index
    %68 = vector.load %arg6[%c0_35, %c0_36] : memref<1x256xf32, #tpu.memory_space<vmem>>, vector<1x256xf32>
    tpu.vector_store %arg6[%c0_35, %c0_36], %67 {strides = array<i32>} : memref<1x256xf32, #tpu.memory_space<vmem>>, vector<1x256xf32>,
    return
  }
  func.func @transform_0(%arg0: i32) -> (i32, i32) {
    %c0_i32 = arith.constant 0 : i32
    %c0_i32_0 = arith.constant 0 : i32
    return %arg0, %c0_i32 : i32, i32
  }
  func.func @transform_1(%arg0: i32) -> (i32, i32) {
    %c0_i32 = arith.constant 0 : i32
    %c0_i32_0 = arith.constant 0 : i32
    %c0_i32_1 = arith.constant 0 : i32
    return %c0_i32, %c0_i32_0 : i32, i32
  }
  func.func @transform_2(%arg0: i32) -> (i32, i32) {
    %c0_i32 = arith.constant 0 : i32
    %c0_i32_0 = arith.constant 0 : i32
    %c0_i32_1 = arith.constant 0 : i32
    return %c0_i32, %c0_i32_0 : i32, i32
  }
  func.func @transform_3(%arg0: i32) -> (i32, i32, i32) {
    %c0_i32 = arith.constant 0 : i32
    %c0_i32_0 = arith.constant 0 : i32
    %c0_i32_1 = arith.constant 0 : i32
    %c0_i32_2 = arith.constant 0 : i32
    return %c0_i32, %c0_i32_0, %c0_i32_1 : i32, i32, i32
  }
  func.func @transform_4(%arg0: i32) -> (i32, i32, i32) {
    %c0_i32 = arith.constant 0 : i32
    %c0_i32_0 = arith.constant 0 : i32
    %c0_i32_1 = arith.constant 0 : i32
    %c0_i32_2 = arith.constant 0 : i32
    return %c0_i32, %c0_i32_0, %c0_i32_1 : i32, i32, i32
  }
  func.func @transform_5(%arg0: i32) -> (i32, i32) {
    %c0_i32 = arith.constant 0 : i32
    %c0_i32_0 = arith.constant 0 : i32
    return %c0_i32, %arg0 : i32, i32
  }
}

</mosaic_0001>

<bundles_post_ra>
// kernel: dnn_forward.1
= control target key start
LH: loop header
LB: loop body
LE: loop exit
PB: predicated region body
PF: predicated region fallthrough
CT: control target
= control target key end

     0   :  { %s3174_s18 = smov 0   ;;  %s5701_s0 = inlined_call_operand.vmem [shape: bf16[512,32], index: 0, kind: input, shape index: {}]   ;;  %s5702_s1 = inlined_call_operand.vmem [shape: bf16[64,32], index: 1, kind: input, shape index: {}]   ;;  %s5703_s2 = inlined_call_operand.vmem [shape: f32[64,1], index: 2, kind: input, shape index: {}]   ;;  %s5704_s3 = inlined_call_operand.vmem [shape: bf16[4,64,64], index: 3, kind: input, shape index: {}]   ;;  %s5705_s4 = inlined_call_operand.vmem [shape: f32[4,64,1], index: 4, kind: input, shape index: {}]   ;;  %s5706_s5 = inlined_call_operand.vmem [shape: f32[1,512], index: 5, kind: output, shape index: {}]  }
   0x1 LB: > { %s2515_s19 = sadd.s32 4294967295, %s3141_s18   ;;  %p2519_p0 = scmp.ge.s32.totalorder %s3141_s18, 1  ;;  %s3141_s18 = sphi %s3174_s18, %s15_s18  }
   0x2   : > { %p188_p1 = scmp.lt.s32.totalorder %s3141_s18, 3 }
   0x4   : > { %p189_p2 = pnand %p2519_p0, %p188_p1 }
   0x6   : > { %192 = sbr.rel (%p189_p2) target bundleno = 1226 (0x4ca), region = 40 }
   0xb   : > { %s2520_s20 = sshll.u32 %s2515_s19, 5  ;;  %vm415_vm0 = vcmask 261120   ;;  %v273_v8 = vld [vmem:[%s5703_s2 + $0x30] sm:$0xff]  ;;  %v271_v9 = vld [vmem:[%s5703_s2 + $0x20] sm:$0xff]  ;;  %v3143_v12 = vmov 0   ;;  %v274_v15 = vld [vmem:[%s5703_s2 + $0x38] sm:$0xff] }
   0xc   : > { %p216_p3 = scmp.lt.s32.totalorder %s2520_s20, 63  ;;  %2868 = vset.pattern.permute.xlu0 %v3143_v12  ;;  %2869 = vset.pattern.permute.xlu1 %v3143_v12  ;;  %v272_v16 = vld [vmem:[%s5703_s2 + $0x28] sm:$0xff]  ;;  %v267_v21 = vld [vmem:[%s5703_s2] sm:$0xff]  ;;  %v877_v27 = vld [vmem:[%s5705_s4 + $0x38] sm:$0xff]  ;;  %s2522_s14 = sshll.u32 %s2515_s19, 1 }
   0xd   : > { %307 = vperm.xlu0 %2868, %v273_v8   ;;  %297 = vperm.xlu1 %2869, %v271_v9   ;;  %v268_v22 = vld [vmem:[%s5703_s2 + $0x8] sm:$0xff]  ;;  %v874_v28 = vld [vmem:[%s5705_s4 + $0x20] sm:$0xff]  ;;  %v269_v29 = vld [vmem:[%s5703_s2 + $0x10] sm:$0xff]  ;;  %p222_p4 = scmp.lt.s32.totalorder %s2522_s14, 3 }
   0xe   : > { %s6171_s20 = smov (!%p216_p3, %s2520_s20), 63  ;;  %2870 = vset.pattern.permute.xlu2 %v3143_v12  ;;  %v872_v34 = vld [vmem:[%s5705_s4 + $0x10] sm:$0xff]  ;;  %v873_v35 = vld [vmem:[%s5705_s4 + $0x18] sm:$0xff]  ;;  %v871_v41 = vld [vmem:[%s5705_s4 + $0x8] sm:$0xff] }
   0xf   : > { %s2521_s21 = sshll.u32 %s6171_s20, 2  ;;  %287 = vperm.xlu2 %2870, %v269_v29   ;;  %v270_v40 = vld [vmem:[%s5703_s2 + $0x18] sm:$0xff]  ;;  %v2681_v42 = vld [vmem:[%s5705_s4 + $0x70] sm:$0xff]  ;;  %v2679_v48 = vld [vmem:[%s5705_s4 + $0x60] sm:$0xff]  ;;  %s6173_s14 = smov (!%p222_p4, %s2522_s14), 3 }
  0x10   : > { %s3187_s24 = scalar_lea.vmem %s5701_s0, %s2521_s21  ;;  %v876_v47 = vld [vmem:[%s5705_s4 + $0x30] sm:$0xff]  ;;  %v2680_v49 = vld [vmem:[%s5705_s4 + $0x68] sm:$0xff]  ;;  %v2839_v50 = vld [vmem:[%s5702_s1] sm:$0xff]  ;;  %s224_s16 = scalar_lea.vmem %s5706_s5, %s6173_s14 }
  0x11   : > { %v2830_v0 = vld [vmem:[%s3187_s24 + $0x38] sm:$0xff]  ;;  %v2829_v4 = vld [vmem:[%s3187_s24 + $0x30] sm:$0xff]  ;;  %v2828_v10 = vld [vmem:[%s3187_s24 + $0x28] sm:$0xff] }
  0x12   : > { %v2838_v1 = vld [vmem:[%s3187_s24 + $0x78] sm:$0xff]  ;;  %v450_v2 = vsel %vm415_vm0, %v2830_v0, 0  ;;  %v2837_v5 = vld [vmem:[%s3187_s24 + $0x70] sm:$0xff]  ;;  %v447_v6 = vsel %vm415_vm0, %v2829_v4, 0  ;;  %v2836_v11 = vld [vmem:[%s3187_s24 + $0x68] sm:$0xff]  ;;  %v444_v13 = vsel %vm415_vm0, %v2828_v10, 0 }
  0x13   : > { %v474_v3 = vsel %vm415_vm0, %v2838_v1, 0  ;;  %476 = vmatpush.bf16.xpose.msra.mxu0 %v450_v2  ;;  %v471_v7 = vsel %vm415_vm0, %v2837_v5, 0  ;;  %v468_v14 = vsel %vm415_vm0, %v2836_v11, 0  ;;  %v2827_v17 = vld [vmem:[%s3187_s24 + $0x20] sm:$0xff]  ;;  %v2826_v23 = vld [vmem:[%s3187_s24 + $0x18] sm:$0xff]  ;;  %v2825_v30 = vld [vmem:[%s3187_s24 + $0x10] sm:$0xff] }
  0x14   : > { %505 = vmatpush.bf16.xpose.msra.mxu1 %v474_v3  ;;  %v2835_v18 = vld [vmem:[%s3187_s24 + $0x60] sm:$0xff]  ;;  %v441_v19 = vsel %vm415_vm0, %v2827_v17, 0  ;;  %v2834_v24 = vld [vmem:[%s3187_s24 + $0x58] sm:$0xff]  ;;  %v438_v25 = vsel %vm415_vm0, %v2826_v23, 0  ;;  %v2833_v31 = vld [vmem:[%s3187_s24 + $0x50] sm:$0xff]  ;;  %v435_v32 = vsel %vm415_vm0, %v2825_v30, 0 }
  0x15   : > { %312 = vperm.xlu0 %2868, %v274_v15   ;;  %302 = vperm.xlu1 %2869, %v272_v16   ;;  %v465_v20 = vsel %vm415_vm0, %v2835_v18, 0  ;;  %v462_v26 = vsel %vm415_vm0, %v2834_v24, 0  ;;  %v459_v33 = vsel %vm415_vm0, %v2833_v31, 0  ;;  %v2824_v36 = vld [vmem:[%s3187_s24 + $0x8] sm:$0xff]  ;;  %v2823_v43 = vld [vmem:[%s3187_s24] sm:$0xff]  ;;  %v2678_v52 = vld [vmem:[%s5705_s4 + $0x58] sm:$0xff] }
  0x16   : > { %v2832_v37 = vld [vmem:[%s3187_s24 + $0x48] sm:$0xff]  ;;  %v432_v38 = vsel %vm415_vm0, %v2824_v36, 0  ;;  %v2831_v44 = vld [vmem:[%s3187_s24 + $0x40] sm:$0xff]  ;;  %v429_v45 = vsel %vm415_vm0, %v2823_v43, 0  ;;  %v2737_v55 = vld [vmem:[%s5705_s4 + $0xb0] sm:$0xff] }
  0x17   : > { %v456_v39 = vsel %vm415_vm0, %v2832_v37, 0  ;;  %292 = vperm.xlu2 %2870, %v270_v40   ;;  %v453_v46 = vsel %vm415_vm0, %v2831_v44, 0  ;;  %v875_v51 = vld [vmem:[%s5705_s4 + $0x28] sm:$0xff]  ;;  %v2675_v53 = vld [vmem:[%s5705_s4 + $0x40] sm:$0xff]  ;;  %v2738_v56 = vld [vmem:[%s5705_s4 + $0xb8] sm:$0xff] }
  0x18   : > { %v870_v54 = vld [vmem:[%s5705_s4] sm:$0xff]  ;;  %v2840_v57 = vld [vmem:[%s5702_s1 + $0x8] sm:$0xff]  ;;  %v2682_v58 = vld [vmem:[%s5705_s4 + $0x78] sm:$0xff] }
  0x19   : > { %v2736_v59 = vld [vmem:[%s5705_s4 + $0xa8] sm:$0xff]  ;;  %v2733_v60 = vld [vmem:[%s5705_s4 + $0x90] sm:$0xff]  ;;  %v2731_v62 = vld [vmem:[%s5705_s4 + $0x80] sm:$0xff] }
  0x1a   : > { %v2677_v61 = vld [vmem:[%s5705_s4 + $0x50] sm:$0xff]  ;;  %v2732_v63 = vld [vmem:[%s5705_s4 + $0x88] sm:$0xff]  ;;  %v2735_v2 = vld [vmem:[%s5705_s4 + $0xa0] sm:$0xff] }
  0x1b   : > { %477 = vmatpush.bf16.xpose.msra.mxu0 %v447_v6  ;;  %v2841_v0 = vld [vmem:[%s5702_s1 + $0x10] sm:$0xff]  ;;  %v2676_v1 = vld [vmem:[%s5705_s4 + $0x48] sm:$0xff]  ;;  %v2842_v3 = vld [vmem:[%s5702_s1 + $0x18] sm:$0xff] }
  0x1c   : > { %506 = vmatpush.bf16.xpose.msra.mxu1 %v471_v7  ;;  %v2734_v4 = vld [vmem:[%s5705_s4 + $0x98] sm:$0xff]  ;;  %v2787_v5 = vld [vmem:[%s5705_s4 + $0xc0] sm:$0xff] }
  0x1d   : > { %277 = vperm.xlu0 %2868, %v267_v21   ;;  %282 = vperm.xlu1 %2869, %v268_v22  }
  0x1f   : > { %910 = vperm.xlu2 %2870, %v876_v47  }
  0x23   : > { %478 = vmatpush.bf16.xpose.msra.mxu0 %v444_v13 }
  0x24   : > { %507 = vmatpush.bf16.xpose.msra.mxu1 %v468_v14 }
  0x25   : > { %915 = vperm.xlu0 %2868, %v877_v27   ;;  %900 = vperm.xlu1 %2869, %v874_v28  }
  0x27   : > { %905 = vperm.xlu2 %2870, %v875_v51  }
  0x2b   : > { %479 = vmatpush.bf16.xpose.msra.mxu0 %v441_v19 }
  0x2c   : > { %508 = vmatpush.bf16.xpose.msra.mxu1 %v465_v20 }
  0x2d   : > { %890 = vperm.xlu0 %2868, %v872_v34   ;;  %895 = vperm.xlu1 %2869, %v873_v35  }
  0x2f   : > { %880 = vperm.xlu2 %2870, %v870_v54  }
  0x33   : > { %480 = vmatpush.bf16.xpose.msra.mxu0 %v438_v25 }
  0x34   : > { %509 = vmatpush.bf16.xpose.msra.mxu1 %v462_v26 }
  0x35   : > { %885 = vperm.xlu0 %2868, %v871_v41   ;;  %1387 = vperm.xlu1 %2869, %v2681_v42  }
  0x37   : > { %1392 = vperm.xlu2 %2870, %v2682_v58  }
  0x3b   : > { %481 = vmatpush.bf16.xpose.msra.mxu0 %v435_v32 }
  0x3c   : > { %510 = vmatpush.bf16.xpose.msra.mxu1 %v459_v33 }
  0x3d   : > { %1377 = vperm.xlu0 %2868, %v2679_v48   ;;  %1382 = vperm.xlu1 %2869, %v2680_v49  }
  0x3f   : > { %1367 = vperm.xlu2 %2870, %v2677_v61  }
  0x43   : > { %482 = vmatpush.bf16.xpose.msra.mxu0 %v432_v38 }
  0x44   : > { %511 = vmatpush.bf16.xpose.msra.mxu1 %v456_v39 }
  0x45   : > { %1372 = vperm.xlu0 %2868, %v2678_v52   ;;  %1357 = vperm.xlu1 %2869, %v2675_v53  }
  0x47   : > { %1362 = vperm.xlu2 %2870, %v2676_v1  }
  0x4b   : > { %483 = vmatpush.bf16.xpose.msra.mxu0 %v429_v45 }
  0x4c   : > { %512 = vmatpush.bf16.xpose.msra.mxu1 %v453_v46 }
  0x4d   : > { %1863 = vperm.xlu0 %2868, %v2737_v55   ;;  %1868 = vperm.xlu1 %2869, %v2738_v56  }
  0x4f   : > { %1853 = vperm.xlu2 %2870, %v2735_v2  }
  0x52   : > { %2603 = vmatmul.msk.bf16.vlgmr.msra.gmra.mxu0 %vm415_vm0, %v2839_v50 }
  0x53   : > { %2607 = vmatmul.msk.bf16.vlgmr.msra.gmra.mxu1 %vm415_vm0, %v2839_v50 }
  0x55   : > { %1858 = vperm.xlu0 %2868, %v2736_v59   ;;  %1843 = vperm.xlu1 %2869, %v2733_v60  }
  0x57   : > { %1848 = vperm.xlu2 %2870, %v2734_v4  }
  0x5d   : > { %1833 = vperm.xlu0 %2868, %v2731_v62   ;;  %1838 = vperm.xlu1 %2869, %v2732_v63  }
  0x5f   : > { %2309 = vperm.xlu2 %2870, %v2787_v5  }
  0x62   : > { %2604 = vmatmul.msk.bf16.gmra.mxu0 %vm415_vm0, %v2840_v57 }
  0x63   : > { %2608 = vmatmul.msk.bf16.gmra.mxu1 %vm415_vm0, %v2840_v57 }
  0x69   : > { %v288_v19 = vpop.permute.xlu2 %287 }
  0x71   : > { %v293_v35 = vpop.permute.xlu2 %292 }
  0x72   : > { %2605 = vmatmul.msk.bf16.gmra.mxu0 %vm415_vm0, %v2841_v0 }
  0x73   : > { %2609 = vmatmul.msk.bf16.gmra.mxu1 %vm415_vm0, %v2841_v0 }
  0x7f   : > { %v3340_v6 = vpop.permute.xlu0 %307  ;;  %v298_v7 = vpop.permute.xlu1 %297 }
  0x82   : > { %2606 = vmatmul.msk.bf16.gmra.mxu0 %vm415_vm0, %v2842_v3 }
  0x83   : > { %2610 = vmatmul.msk.bf16.gmra.mxu1 %vm415_vm0, %v2842_v3 }
  0x87   : > { %v3342_v8 = vpop.permute.xlu0 %312  ;;  %v3344_v11 = vpop.permute.xlu1 %302 }
  0x8f   : > { %v278_v12 = vpop.permute.xlu0 %277  ;;  %v283_v20 = vpop.permute.xlu1 %282 }
  0xcf   : > { %v485_v9 = vpop.f32.mrf.mxu0 }
  0xd0   : > { %v514_v10 = vpop.f32.mrf.mxu1  ;;  %v3346_v13 = vadd.f32 %v485_v9, %v278_v12 }
  0xd1   : > { %v3348_v16 = vadd.f32 %v514_v10, %v278_v12 }
  0xd2   : > { %5754 = vst [vmem:[#allocation2_spill] sm:$0xff] %v3346_v13  ;;  %v2611_v17 = vmul.f32 -1.442695, %v3346_v13 }
  0xd3   : > { %5755 = vst [vmem:[#allocation3_spill] sm:$0xff] %v3348_v16  ;;  %v2612_v18 = vmul.f32 -1.442695, %v3348_v16 }
  0xd4   : > { %2871 = vpow2.f32 %v2611_v17 }
  0xd5   : > { %2873 = vpow2.f32 %v2612_v18 }
  0xd7   : > { %v487_v14 = vpop.f32.mrf.mxu0 }
  0xd8   : > { %v516_v15 = vpop.f32.mrf.mxu1  ;;  %v3352_v21 = vadd.f32 %v487_v14, %v283_v20 }
  0xd9   : > { %v3356_v25 = vadd.f32 %v516_v15, %v283_v20 }
  0xda   : > { %5756 = vst [vmem:[#allocation4_spill] sm:$0xff] %v3352_v21  ;;  %v2613_v27 = vmul.f32 -1.442695, %v3352_v21  ;;  %v2872_v28 = vpop.eup %2871 }
  0xdb   : > { %5758 = vst [vmem:[#allocation6_spill] sm:$0xff] %v3356_v25  ;;  %v2614_v29 = vmul.f32 -1.442695, %v3356_v25  ;;  %v2874_v30 = vpop.eup %2873  ;;  %v3361_v31 = vadd.f32 1.0, %v2872_v28 }
  0xdc   : > { %v3365_v36 = vadd.f32 1.0, %v2874_v30 }
  0xdd   : > { %vm603_vm1 = vweird.f32 %v3361_v31 }
  0xdf   : > { %v490_v22 = vpop.f32.mrf.mxu0 }
  0xe0   : > { %v519_v23 = vpop.f32.mrf.mxu1  ;;  %v3354_v24 = vadd.f32 %v490_v22, %v288_v19 }
  0xe1   : > { %v3363_v34 = vadd.f32 %v519_v23, %v288_v19  ;;  %v609_v19 = vand.u32 2147483648, %v3361_v31 }
  0xe2   : > { %5757 = vst [vmem:[#allocation5_spill] sm:$0xff] %v3354_v24  ;;  %v2615_v26 = vmul.f32 -1.442695, %v3354_v24 }
  0xe3   : > { %5759 = vst [vmem:[#allocation7_spill] sm:$0xff] %v3363_v34  ;;  %v2616_v40 = vmul.f32 -1.442695, %v3363_v34 }
  0xe4   : > { %2875 = vpow2.f32 %v2615_v26 }
  0xe5   : > { %2877 = vpow2.f32 %v2613_v27 }
  0xe6   : > { %2879 = vpow2.f32 %v2614_v29 }
  0xe7   : > { %v492_v32 = vpop.f32.mrf.mxu0  ;;  %2881 = vrcp.f32 %v3361_v31 }
  0xe8   : > { %v521_v33 = vpop.f32.mrf.mxu1  ;;  %v3368_v38 = vadd.f32 %v492_v32, %v293_v35  ;;  %2883 = vrcp.f32 %v3365_v36 }
  0xe9   : > { %v3377_v47 = vadd.f32 %v521_v33, %v293_v35  ;;  %2885 = vpow2.f32 %v2616_v40 }
  0xea   : > { %v2876_v37 = vpop.eup %2875  ;;  %v2617_v42 = vmul.f32 -1.442695, %v3368_v38 }
  0xeb   : > { %v2878_v39 = vpop.eup %2877  ;;  %v3372_v41 = vadd.f32 1.0, %v2876_v37  ;;  %5760 = vst [vmem:[#allocation8_spill] sm:$0xff] %v3377_v47  ;;  %v2618_v54 = vmul.f32 -1.442695, %v3377_v47  ;;  %v3438_v37 = vor.u32 1.1754944e-38, %v609_v19 }
  0xec   : > { %v2880_v45 = vpop.eup %2879  ;;  %v3375_v46 = vadd.f32 1.0, %v2878_v39 }
  0xed   : > { %v3379_v48 = vpop.eup %2881  ;;  %2887 = vrcp.f32 %v3372_v41  ;;  %v3384_v50 = vadd.f32 1.0, %v2880_v45  ;;  %5764 = vst [vmem:[#allocation12_spill] sm:$0xff] %v3438_v37  ;;  %vm663_vm6 = vweird.f32 %v3372_v41 }
  0xee   : > { %5761 = vst [vmem:[#allocation9_spill] sm:$0xff] %v3379_v48  ;;  %2889 = vpow2.f32 %v2617_v42  ;;  %v3387_v52 = vpop.eup %2883  ;;  %v599_v53 = vmul.f32 %v3379_v48, %v3361_v31  ;;  %vm604_vm2 = vweird.f32 %v3379_v48  ;;  %v639_v23 = vand.u32 2147483648, %v3375_v46 }
  0xef   : > { %v495_v43 = vpop.f32.mrf.mxu0  ;;  %2891 = vrcp.f32 %v3375_v46  ;;  %v2886_v56 = vpop.eup %2885  ;;  %v614_v57 = vmul.f32 %v3387_v52, %v3365_v36  ;;  %vm633_vm3 = vweird.f32 %v3375_v46  ;;  %vm3458_vm4 = vmor %vm603_vm1, %vm604_vm2 }
  0xf0   : > { %v524_v44 = vpop.f32.mrf.mxu1  ;;  %v3381_v49 = vadd.f32 %v495_v43, %v298_v7  ;;  %v600_v60 = vsub.f32 1.0, %v599_v53  ;;  %v3406_v2 = vadd.f32 1.0, %v2886_v56  ;;  %v667_v53 = vand.u32 2147483647, %v3372_v41 }
  0xf1   : > { %v3393_v55 = vadd.f32 %v524_v44, %v298_v7  ;;  %v615_v4 = vsub.f32 1.0, %v614_v57  ;;  %v3447_v44 = vor.u32 1.1754944e-38, %v639_v23 }
  0xf2   : > { %v2619_v51 = vmul.f32 -1.442695, %v3381_v49  ;;  %v601_v5 = vmul.f32 %v3379_v48, %v600_v60  ;;  %vm3487_vm8 = vcmp.eq.f32.partialorder %v667_v53, 8.507059e+37 }
  0xf3   : > { %5762 = vst [vmem:[#allocation10_spill] sm:$0xff] %v3393_v55  ;;  %v3398_v59 = vpop.eup %2887  ;;  %v2620_v61 = vmul.f32 -1.442695, %v3393_v55  ;;  %v616_v28 = vmul.f32 %v3387_v52, %v615_v4 }
  0xf4   : > { %2893 = vpow2.f32 %v2619_v51  ;;  %v2890_v63 = vpop.eup %2889  ;;  %v659_v7 = vmul.f32 %v3398_v59, %v3372_v41  ;;  %v3430_v27 = vadd.f32 %v3379_v48, %v601_v5  ;;  %vm664_vm7 = vweird.f32 %v3398_v59 }
  0xf5   : > { %2895 = vrcp.f32 %v3384_v50  ;;  %v3404_v1 = vpop.eup %2891  ;;  %v3411_v9 = vadd.f32 1.0, %v2890_v63  ;;  %v3463_v56 = vadd.f32 %v3387_v52, %v616_v28  ;;  %vm3520_vm9 = vmor %vm663_vm6, %vm664_vm7 }
  0xf6   : > { %2897 = vpow2.f32 %v2618_v54  ;;  %v629_v14 = vmul.f32 %v3404_v1, %v3375_v46  ;;  %5763 = vst [vmem:[#allocation11_spill] sm:$0xff] %v3430_v27  ;;  %v660_v29 = vsub.f32 1.0, %v659_v7  ;;  %vm634_vm5 = vweird.f32 %v3404_v1 }
  0xf7   : > { %v497_v58 = vpop.f32.mrf.mxu0  ;;  %2899 = vpow2.f32 %v2620_v61  ;;  %5768 = vst [vmem:[#allocation14_spill] sm:$0xff] %v3463_v56  ;;  %v699_v53 = vand.u32 2147483648, %v3411_v9  ;;  %vm3530_vm10 = vmor %vm633_vm3, %vm634_vm5  ;;  %vm693_vm11 = vweird.f32 %v3411_v9 }
  0xf8   : > { %v526_v62 = vpop.f32.mrf.mxu1  ;;  %v3402_v0 = vadd.f32 %v497_v58, %v3344_v11  ;;  %2901 = vrcp.f32 %v3406_v2  ;;  %v630_v32 = vsub.f32 1.0, %v629_v14  ;;  %v661_v57 = vmul.f32 %v3398_v59, %v660_v29 }
  0xf9   : > { %v3444_v42 = vadd.f32 %v526_v62, %v3344_v11  ;;  %v5765_v11 = vmov 0 }
  0xfa   : > { %v2894_v3 = vpop.eup %2893  ;;  %v2621_v15 = vmul.f32 -1.442695, %v3402_v0  ;;  %v5766_v11 = vsel %vm3458_vm4, 4294967295, %v5765_v11  ;;  %v631_v62 = vmul.f32 %v3404_v1, %v630_v32  ;;  %v662_v23 = vadd.f32 %v3398_v59, %v661_v57 }
  0xfb   : > { %v3413_v10 = vadd.f32 1.0, %v2894_v3  ;;  %v3415_v12 = vpop.eup %2895  ;;  %5767 = vst [vmem:[#allocation13_spill] sm:$0xff] %v5766_v11  ;;  %v2622_v4 = vmul.f32 -1.442695, %v3444_v42 }
  0xfc   : > { %v2898_v17 = vpop.eup %2897  ;;  %v644_v33 = vmul.f32 %v3415_v12, %v3384_v50  ;;  %v3501_v29 = vadd.f32 %v3404_v1, %v631_v62 }
  0xfd   : > { %2903 = vrcp.f32 %v3413_v10  ;;  %v2900_v30 = vpop.eup %2899  ;;  %v3436_v35 = vadd.f32 1.0, %v2898_v17  ;;  %vm723_vm12 = vweird.f32 %v3413_v10 }
  0xfe   : > { %2905 = vrcp.f32 %v3411_v9  ;;  %v3441_v40 = vadd.f32 1.0, %v2900_v30  ;;  %v3452_v54 = vpop.eup %2901  ;;  %v645_v63 = vsub.f32 1.0, %v644_v33 }
  0xff   : > { %v500_v26 = vpop.f32.mrf.mxu0  ;;  %2907 = vpow2.f32 %v2621_v15  ;;  %v669_v15 = vand.u32 2147483648, %v3372_v41  ;;  %v674_v17 = vmul.f32 %v3452_v54, %v3406_v2  ;;  %v666_v41 = vsel %vm3520_vm9, %v3398_v59, %v662_v23 }
 0x100   : > { %v529_v43 = vpop.f32.mrf.mxu1  ;;  %2909 = vrcp.f32 %v3441_v40  ;;  %v3468_v58 = vadd.f32 %v500_v26, %v3340_v6  ;;  %v646_v30 = vmul.f32 %v3415_v12, %v645_v63  ;;  %v3548_v59 = vor.u32 1.1754944e-38, %v699_v53 }
 0x101   : > { %2911 = vrcp.f32 %v3436_v35  ;;  %v3484_v5 = vadd.f32 %v529_v43, %v3340_v6  ;;  %v670_v63 = vor.u32 1.1754944e-38, %v669_v15  ;;  %vm738_vm1 = vweird.f32 %v3441_v40 }
 0x102   : > { %v2623_v28 = vmul.f32 -1.442695, %v3468_v58  ;;  %2913 = vpow2.f32 %v2622_v4  ;;  %v675_v4 = vsub.f32 1.0, %v674_v17 }
 0x103   : > { %v3470_v60 = vpop.eup %2903  ;;  %v2624_v57 = vmul.f32 -1.442695, %v3484_v5 }
 0x104   : > { %v3478_v3 = vpop.eup %2905  ;;  %v719_v26 = vmul.f32 %v3470_v60, %v3413_v10  ;;  %vm724_vm14 = vweird.f32 %v3470_v60 }
 0x105   : > { %v2908_v7 = vpop.eup %2907  ;;  %v689_v43 = vmul.f32 %v3478_v3, %v3411_v9  ;;  %vm694_vm13 = vweird.f32 %v3478_v3  ;;  %vm3600_vm0 = vmor %vm723_vm12, %vm724_vm14 }
 0x106   : > { %v3497_v6 = vadd.f32 1.0, %v2908_v7  ;;  %v3507_v33 = vpop.eup %2909  ;;  %v720_v51 = vsub.f32 1.0, %v719_v26  ;;  %vm3620_vm2 = vmor %vm693_vm11, %vm694_vm13 }
 0x107   : > { %v502_v19 = vpop.f32.mrf.mxu0  ;;  %v3514_v7 = vpop.eup %2911  ;;  %v734_v45 = vmul.f32 %v3507_v33, %v3441_v40  ;;  %v690_v62 = vsub.f32 1.0, %v689_v43  ;;  %v729_v43 = vand.u32 2147483648, %v3413_v10  ;;  %vm739_vm3 = vweird.f32 %v3507_v33 }
 0x108   : > { %v3505_v32 = vadd.f32 %v502_v19, %v3342_v8  ;;  %2915 = vrcp.f32 %v3497_v6  ;;  %v531_v17 = vpop.f32.mrf.mxu1  ;;  %v3543_v19 = vadd.f32 %v3415_v12, %v646_v30  ;;  %v704_v23 = vmul.f32 %v3514_v7, %v3436_v35  ;;  %v2914_v26 = vpop.eup %2913  ;;  %vm3655_vm7 = vmor %vm738_vm1, %vm739_vm3 }
 0x109   : > { %2917 = vpow2.f32 %v2623_v28  ;;  %v3554_v28 = vsel %vm3487_vm8, %v670_v63, %v666_v41  ;;  %v676_v30 = vmul.f32 %v3452_v54, %v675_v4  ;;  %v3558_v61 = vadd.f32 %v531_v17, %v3342_v8 }
 0x10a   : > { %v2625_v15 = vmul.f32 -1.442695, %v3505_v32  ;;  %5775 = vst [vmem:[#allocation15_spill] sm:$0xff] %v3543_v19  ;;  %2919 = vpow2.f32 %v2624_v57  ;;  %v721_v53 = vmul.f32 %v3470_v60, %v720_v51  ;;  %v727_v57 = vand.u32 2147483647, %v3413_v10 }
 0x10b   : > { %5776 = vst [vmem:[#allocation16_spill] sm:$0xff] %v3554_v28  ;;  %v3566_v39 = vadd.f32 1.0, %v2914_v26  ;;  %v735_v63 = vsub.f32 1.0, %v734_v45  ;;  %v2626_v8 = vmul.f32 -1.442695, %v3558_v61  ;;  %v705_v17 = vsub.f32 1.0, %v704_v23 }
 0x10c   : > { %2921 = vpow2.f32 %v2625_v15  ;;  %v691_v15 = vmul.f32 %v3478_v3, %v690_v62  ;;  %v3576_v51 = vadd.f32 %v3452_v54, %v676_v30  ;;  %v722_v14 = vadd.f32 %v3470_v60, %v721_v53 }
 0x10d   : > { %2923 = vrcp.f32 %v3566_v39  ;;  %vm3584_vm15 = vcmp.eq.f32.partialorder %v727_v57, 8.507059e+37  ;;  %v736_v30 = vmul.f32 %v3507_v33, %v735_v63  ;;  %v706_v16 = vmul.f32 %v3514_v7, %v705_v17 }
 0x10e   : > { %v3560_v18 = vpop.eup %2915  ;;  %2925 = vpow2.f32 %v2626_v8  ;;  %v3593_v8 = vadd.f32 %v3478_v3, %v691_v15  ;;  %v730_v53 = vor.u32 1.1754944e-38, %v729_v43  ;;  %v757_v63 = vand.u32 2147483647, %v3497_v6 }
 0x10f   : > { %v749_v4 = vmul.f32 %v3560_v18, %v3497_v6  ;;  %v2918_v41 = vpop.eup %2917  ;;  %v726_v43 = vsel %vm3600_vm0, %v3470_v60, %v722_v14  ;;  %v3625_v34 = vadd.f32 %v3507_v33, %v736_v30  ;;  %v3636_v17 = vadd.f32 %v3514_v7, %v706_v16 }
 0x110   : > { %v3579_v26 = vadd.f32 1.0, %v2918_v41  ;;  %v2920_v45 = vpop.eup %2919  ;;  %vm753_vm5 = vweird.f32 %v3497_v6  ;;  %vm3647_vm6 = vcmp.eq.f32.partialorder %v757_v63, 8.507059e+37  ;;  %vm754_vm8 = vweird.f32 %v3560_v18 }
 0x111   : > { %v750_v20 = vsub.f32 1.0, %v749_v4  ;;  %v3590_v41 = vadd.f32 1.0, %v2920_v45  ;;  %v759_v4 = vand.u32 2147483648, %v3497_v6  ;;  %vm3687_vm14 = vmor %vm753_vm5, %vm754_vm8 }
 0x112   : > { %v2922_v23 = vpop.eup %2921  ;;  %2927 = vrcp.f32 %v3579_v26  ;;  %v787_v57 = vand.u32 2147483647, %v3579_v26  ;;  %v789_v16 = vand.u32 2147483648, %v3579_v26  ;;  %vm783_vm9 = vweird.f32 %v3579_v26 }
 0x113   : > { %v3596_v25 = vadd.f32 1.0, %v2922_v23  ;;  %2929 = vrcp.f32 %v3590_v41  ;;  %v3608_v15 = vpop.eup %2923  ;;  %v751_v60 = vmul.f32 %v3560_v18, %v750_v20  ;;  %v3645_v20 = vsel %vm3584_vm15, %v730_v53, %v726_v43 }
 0x114   : > { %v2926_v45 = vpop.eup %2925  ;;  %v764_v14 = vmul.f32 %v3608_v15, %v3566_v39  ;;  %v760_v47 = vor.u32 1.1754944e-38, %v759_v4  ;;  %vm798_vm11 = vweird.f32 %v3590_v41  ;;  %vm3677_vm13 = vcmp.eq.f32.partialorder %v787_v57, 8.507059e+37 }
 0x115   : > { %2931 = vrcp.f32 %v3596_v25  ;;  %v3639_v10 = vadd.f32 1.0, %v2926_v45  ;;  %v752_v43 = vadd.f32 %v3560_v18, %v751_v60  ;;  %v790_v4 = vor.u32 1.1754944e-38, %v789_v16  ;;  %v5841_v45 = vld [vmem:[#allocation5_spill] sm:$0xff] }
 0x116   : > { %v765_v21 = vsub.f32 1.0, %v764_v14  ;;  %v802_v14 = vand.u32 2147483647, %v3590_v41  ;;  %v817_v55 = vand.u32 2147483647, %v3596_v25  ;;  %v819_v24 = vand.u32 2147483648, %v3596_v25 }
 0x117   : > { %2933 = vrcp.f32 %v3639_v10  ;;  %v756_v16 = vsel %vm3687_vm14, %v3560_v18, %v752_v43  ;;  %vm769_vm1 = vweird.f32 %v3608_v15  ;;  %vm5803_vm0 = vweird.f32 %v3596_v25 }
 0x118   : > { %v3641_v30 = vpop.eup %2927  ;;  %v766_v11 = vmul.f32 %v3608_v15, %v765_v21  ;;  %v761_v43 = vsel %vm3647_vm6, %v760_v47, %v756_v16  ;;  %vm3741_vm6 = vcmp.eq.f32.partialorder %v817_v55, 8.507059e+37  ;;  %v820_v55 = vor.u32 1.1754944e-38, %v819_v24 }
 0x119   : > { %v779_v53 = vmul.f32 %v3641_v30, %v3579_v26  ;;  %v3664_v63 = vpop.eup %2929  ;;  %vm784_vm15 = vweird.f32 %v3641_v30  ;;  %v848_v47 = vmul.f32 %v761_v43, %v3402_v0  ;;  %v5820_v0 = vand.u32 2147483648, %v3441_v40 }
 0x11a   : > { %v794_v62 = vmul.f32 %v3664_v63, %v3590_v41  ;;  %vm799_vm5 = vweird.f32 %v3664_v63  ;;  %vm3719_vm3 = vmor %vm783_vm9, %vm784_vm15  ;;  %v767_v19 = vadd.f32 %v3608_v15, %v766_v11  ;;  %v832_v11 = vand.u32 2147483647, %v3639_v10 }
 0x11b   : > { %v2932_v37 = vpop.eup %2931  ;;  %v780_v27 = vsub.f32 1.0, %v779_v53  ;;  %v5791_v53 = vand.u32 2147483647, %v3411_v9 }
 0x11c   : > { %v809_v60 = vmul.f32 %v2932_v37, %v3596_v25  ;;  %v795_v57 = vsub.f32 1.0, %v794_v62  ;;  %vm814_vm12 = vweird.f32 %v2932_v37 }
 0x11d   : > { %v781_v56 = vmul.f32 %v3641_v30, %v780_v27  ;;  %v3700_v28 = vpop.eup %2933  ;;  %vm3709_vm8 = vcmp.eq.f32.partialorder %v5791_v53, 8.507059e+37  ;;  %vm815_vm14 = vmor %vm5803_vm0, %vm814_vm12  ;;  %vm5807_vm0 = vweird.f32 %v3566_v39  ;;  %v5842_v53 = vld [vmem:[#allocation16_spill] sm:$0xff] }
 0x11e   : > { %v810_v6 = vsub.f32 1.0, %v809_v60  ;;  %v796_v62 = vmul.f32 %v3664_v63, %v795_v57  ;;  %v824_v9 = vmul.f32 %v3700_v28, %v3639_v10  ;;  %v804_v57 = vand.u32 2147483648, %v3590_v41  ;;  %vm3778_vm9 = vmor %vm5807_vm0, %vm769_vm1 }
 0x11f   : > { %v782_v27 = vadd.f32 %v3641_v30, %v781_v56  ;;  %v5804_v41 = vand.u32 2147483647, %v3375_v46  ;;  %vm829_vm12 = vweird.f32 %v3700_v28  ;;  %vm5816_vm0 = vweird.f32 %v3514_v7 }
 0x120   : > { %v811_v56 = vmul.f32 %v2932_v37, %v810_v6  ;;  %v797_v26 = vadd.f32 %v3664_v63, %v796_v62  ;;  %v5796_v6 = vand.u32 2147483647, %v3441_v40  ;;  %v825_v16 = vsub.f32 1.0, %v824_v9 }
 0x121   : > { %v786_v60 = vsel %vm3719_vm3, %v3641_v30, %v782_v27  ;;  %vm3749_vm3 = vmor %vm798_vm11, %vm799_vm5  ;;  %v834_v62 = vand.u32 2147483648, %v3639_v10  ;;  %vm3763_vm11 = vcmp.eq.f32.partialorder %v5804_v41, 8.507059e+37  ;;  %v771_v9 = vsel %vm3778_vm9, %v3608_v15, %v767_v19  ;;  %v5844_v41 = vld [vmem:[#allocation10_spill] sm:$0xff] }
 0x122   : > { %vm3736_vm15 = vcmp.eq.f32.partialorder %v5796_v6, 8.507059e+37  ;;  %v812_v13 = vadd.f32 %v2932_v37, %v811_v56  ;;  %v791_v27 = vsel %vm3677_vm13, %v790_v4, %v786_v60  ;;  %v801_v48 = vsel %vm3749_vm3, %v3664_v63, %v797_v26  ;;  %v5858_v15 = vld [vmem:[#allocation6_spill] sm:$0xff] }
 0x123   : > { %v826_v25 = vmul.f32 %v3700_v28, %v825_v16  ;;  %vm618_vm13 = vweird.f32 %v3365_v36  ;;  %vm828_vm3 = vweird.f32 %v3639_v10  ;;  %v5810_v63 = vand.u32 2147483647, %v3361_v31 }
 0x124   : > { %v816_v56 = vsel %vm815_vm14, %v2932_v37, %v812_v13  ;;  %vm803_vm14 = vcmp.eq.f32.partialorder %v802_v14, 8.507059e+37  ;;  %v805_v37 = vor.u32 1.1754944e-38, %v804_v57  ;;  %v850_v60 = vmul.f32 %v791_v27, %v3468_v58 }
 0x125   : > { %v821_v46 = vsel %vm3741_vm6, %v820_v55, %v816_v56  ;;  %vm3787_vm5 = vcmp.eq.f32.partialorder %v5810_v63, 8.507059e+37  ;;  %v827_v6 = vadd.f32 %v3700_v28, %v826_v25  ;;  %v5813_v14 = vand.u32 2147483647, %v3566_v39  ;;  %vm830_vm6 = vmor %vm828_vm3, %vm829_vm12  ;;  %v5847_v25 = vld [vmem:[#allocation11_spill] sm:$0xff] }
 0x126   : > { %v852_v26 = vmul.f32 %v821_v46, %v3505_v32  ;;  %v5814_v10 = vand.u32 2147483648, %v3566_v39  ;;  %v806_v57 = vsel %vm803_vm14, %v805_v37, %v801_v48  ;;  %v835_v13 = vor.u32 1.1754944e-38, %v834_v62  ;;  %v5846_v48 = vld [vmem:[#allocation9_spill] sm:$0xff]  ;;  %v5849_v46 = vld [vmem:[#allocation12_spill] sm:$0xff] }
 0x127   : > { %vm773_vm1 = vcmp.eq.f32.partialorder %v5813_v14, 8.507059e+37  ;;  %v831_v58 = vsel %vm830_vm6, %v3700_v28, %v827_v6  ;;  %vm833_vm9 = vcmp.eq.f32.partialorder %v832_v11, 8.507059e+37  ;;  %v5815_v32 = vsel %vm3620_vm2, %v3478_v3, %v3593_v8  ;;  %v5853_v14 = vld [vmem:[#allocation8_spill] sm:$0xff]  ;;  %v5859_v3 = vld [vmem:[#allocation3_spill] sm:$0xff] }
 0x128   : > { %v775_v31 = vor.u32 1.1754944e-38, %v5814_v10  ;;  %v868_v19 = vpack.c.bf16 %v852_v26, %v850_v60  ;;  %v701_v39 = vsel %vm3709_vm8, %v3548_v59, %v5815_v32  ;;  %vm5817_vm12 = vweird.f32 %v3436_v35  ;;  %v5852_v26 = vld [vmem:[#allocation4_spill] sm:$0xff] }
 0x129   : > { %vm3817_vm14 = vmor %vm5817_vm12, %vm5816_vm0  ;;  %v745_v28 = vor.u32 1.1754944e-38, %v5820_v0  ;;  %v836_v23 = vsel %vm833_vm9, %v835_v13, %v831_v58  ;;  %vm5821_vm3 = vweird.f32 %v3452_v54  ;;  %vm5822_vm2 = vweird.f32 %v3406_v2 }
 0x12a   : > { %v776_v43 = vsel %vm773_vm1, %v775_v31, %v771_v9  ;;  %vm3827_vm6 = vmor %vm5822_vm2, %vm5821_vm3  ;;  %v711_v59 = vsel %vm3817_vm14, %v3514_v7, %v3636_v17  ;;  %v846_v8 = vmul.f32 %v3645_v20, %v3381_v49  ;;  %955 = vmatpush.bf16.msra.mxu2 %v868_v19  ;;  %v851_v40 = vmul.f32 %v806_v57, %v3484_v5  ;;  %v5855_v19 = vld [vmem:[#allocation2_spill] sm:$0xff] }
 0x12b   : > { %v853_v18 = vmul.f32 %v836_v23, %v3558_v61  ;;  %v681_v30 = vsel %vm3827_vm6, %v3452_v54, %v3576_v51  ;;  %v5825_v16 = vand.u32 2147483647, %v3436_v35  ;;  %v5826_v27 = vand.u32 2147483648, %v3436_v35  ;;  %v2843_v23 = vld [vmem:[%s5704_s3] sm:$0xff] }
 0x12c   : > { %v5827_v49 = vsel %vm3655_vm7, %v3507_v33, %v3625_v34  ;;  %v844_v61 = vmul.f32 %v701_v39, %v3368_v38  ;;  %v849_v7 = vmul.f32 %v776_v43, %v3444_v42  ;;  %v866_v54 = vpack.c.bf16 %v848_v47, %v846_v8  ;;  %v5840_v33 = vld [vmem:[#allocation15_spill] sm:$0xff] }
 0x12d   : > { %vm713_vm8 = vcmp.eq.f32.partialorder %v5825_v16, 8.507059e+37  ;;  %v715_v55 = vor.u32 1.1754944e-38, %v5826_v27  ;;  %v746_v5 = vsel %vm3736_vm15, %v745_v28, %v5827_v49  ;;  %v869_v17 = vpack.c.bf16 %v853_v18, %v851_v40  ;;  %v2844_v8 = vld [vmem:[%s5704_s3 + $0x8] sm:$0xff]  ;;  %v2845_v40 = vld [vmem:[%s5704_s3 + $0x10] sm:$0xff]  ;;  %v2846_v18 = vld [vmem:[%s5704_s3 + $0x18] sm:$0xff]  ;;  %v3945_v27 = vpop.permute.xlu0 %915 }
 0x12e   : > { %v5828_v35 = vsel %vm3530_vm10, %v3404_v1, %v3501_v29  ;;  %vm5829_vm7 = vweird.f32 %v3415_v12  ;;  %vm5830_vm1 = vweird.f32 %v3384_v50  ;;  %v5833_v38 = vand.u32 2147483647, %v3384_v50  ;;  %956 = vmatpush.bf16.msra.mxu2 %v866_v54 }
 0x12f   : > { %v641_v51 = vsel %vm3763_vm11, %v3447_v44, %v5828_v35  ;;  %vm3868_vm15 = vmor %vm5830_vm1, %vm5829_vm7  ;;  %v5836_v1 = vand.u32 2147483648, %v3406_v2  ;;  %v716_v29 = vsel %vm713_vm8, %v715_v55, %v711_v59  ;;  %vm5837_vm10 = vweird.f32 %v3387_v52  ;;  %984 = vmatpush.bf16.msra.mxu3 %v869_v17 }
 0x130   : > { %vm3874_vm9 = vcmp.eq.f32.partialorder %v5833_v38, 8.507059e+37  ;;  %vm3884_vm11 = vmor %vm618_vm13, %vm5837_vm10  ;;  %v651_v20 = vsel %vm3868_vm15, %v3415_v12, %v5840_v33  ;;  %v842_v11 = vmul.f32 %v5842_v53, %v5841_v45  ;;  %v5843_v62 = vand.u32 2147483647, %v3406_v2  ;;  %v5850_v12 = vld [vmem:[#allocation14_spill] sm:$0xff] }
 0x131   : > { %v685_v22 = vor.u32 1.1754944e-38, %v5836_v1  ;;  %v847_v21 = vmul.f32 %v746_v5, %v5844_v41  ;;  %v5848_v24 = vsel %vm3458_vm4, %v5846_v48, %v5847_v25  ;;  %v621_v63 = vsel %vm3884_vm11, %v3387_v52, %v5850_v12  ;;  %v901_v1 = vpop.permute.xlu1 %900 }
 0x132   : > { %vm683_vm0 = vcmp.eq.f32.partialorder %v5843_v62, 8.507059e+37  ;;  %v611_v37 = vsel %vm3787_vm5, %v5849_v46, %v5848_v24  ;;  %v5851_v2 = vand.u32 2147483648, %v3384_v50  ;;  %v840_v6 = vmul.f32 %v641_v51, %v5852_v26  ;;  %v5857_v50 = vld [vmem:[#allocation7_spill] sm:$0xff] }
 0x133   : > { %v686_v60 = vsel %vm683_vm0, %v685_v22, %v681_v30  ;;  %v845_v10 = vmul.f32 %v716_v29, %v5853_v14  ;;  %v867_v31 = vpack.c.bf16 %v849_v7, %v847_v21  ;;  %v864_v57 = vpack.c.bf16 %v844_v61, %v842_v11  ;;  %v3943_v30 = vpop.permute.xlu2 %910 }
 0x134   : > { %v655_v9 = vor.u32 1.1754944e-38, %v5851_v2  ;;  %v5854_v13 = vand.u32 2147483648, %v3365_v36  ;;  %v838_v58 = vmul.f32 %v611_v37, %v5855_v19  ;;  %v5856_v52 = vand.u32 2147483647, %v3365_v36 }
 0x135   : > { %v843_v32 = vmul.f32 %v686_v60, %v5857_v50  ;;  %985 = vmatpush.bf16.msra.mxu3 %v867_v31  ;;  %957 = vmatpush.bf16.msra.mxu2 %v864_v57  ;;  %vm5733_vm5 = vcmask 523264   ;;  %v891_v61 = vpop.permute.xlu0 %890 }
 0x136   : > { %v625_v47 = vor.u32 1.1754944e-38, %v5854_v13  ;;  %v656_v4 = vsel %vm3874_vm9, %v655_v9, %v651_v20  ;;  %vm623_vm4 = vcmp.eq.f32.partialorder %v5856_v52, 8.507059e+37  ;;  %v862_v43 = vpack.c.bf16 %v840_v6, %v838_v58 }
 0x137   : > { %v841_v0 = vmul.f32 %v656_v4, %v5858_v15  ;;  %v865_v28 = vpack.c.bf16 %v845_v10, %v843_v32 }
 0x138   : > { %v626_v39 = vsel %vm623_vm4, %v625_v47, %v621_v63 }
 0x139   : > { %v839_v59 = vmul.f32 %v626_v39, %v5859_v3  ;;  %986 = vmatpush.bf16.msra.mxu3 %v865_v28  ;;  %958 = vmatpush.bf16.msra.mxu2 %v862_v43  ;;  %v896_v25 = vpop.permute.xlu1 %895 }
 0x13b   : > { %v863_v36 = vpack.c.bf16 %v841_v0, %v839_v59  ;;  %v3947_v5 = vpop.permute.xlu2 %905 }
 0x13c   : > { %2643 = vmatmul.msk.bf16.vlgmr.msra.gmra.mxu2 %vm5733_vm5, %v2843_v23 }
 0x13d   : > { %987 = vmatpush.bf16.msra.mxu3 %v863_v36  ;;  %v886_v38 = vpop.permute.xlu0 %885 }
 0x140   : > { %2647 = vmatmul.msk.bf16.vlgmr.msra.gmra.mxu3 %vm5733_vm5, %v2843_v23 }
 0x143   : > { %v881_v54 = vpop.permute.xlu2 %880 }
 0x14c   : > { %2644 = vmatmul.msk.bf16.gmra.mxu2 %vm5733_vm5, %v2844_v8 }
 0x150   : > { %2648 = vmatmul.msk.bf16.gmra.mxu3 %vm5733_vm5, %v2844_v8 }
 0x15c   : > { %2645 = vmatmul.msk.bf16.gmra.mxu2 %vm5733_vm5, %v2845_v40 }
 0x160   : > { %2649 = vmatmul.msk.bf16.gmra.mxu3 %vm5733_vm5, %v2845_v40 }
 0x16c   : > { %2646 = vmatmul.msk.bf16.gmra.mxu2 %vm5733_vm5, %v2846_v18 }
 0x170   : > { %2650 = vmatmul.msk.bf16.gmra.mxu3 %vm5733_vm5, %v2846_v18 }
 0x1bf   : > { %v960_v16 = vpop.f32.mrf.mxu2 }
 0x1c0   : > { %v3949_v35 = vadd.f32 %v960_v16, %v881_v54 }
 0x1c2   : > { %5860 = vst [vmem:[#allocation15_spill] sm:$0xff] %v3949_v35  ;;  %v2651_v22 = vmul.f32 -1.442695, %v3949_v35 }
 0x1c3   : > { %v989_v55 = vpop.f32.mrf.mxu3 }
 0x1c4   : > { %v3951_v34 = vadd.f32 %v989_v55, %v881_v54  ;;  %2935 = vpow2.f32 %v2651_v22 }
 0x1c6   : > { %5861 = vst [vmem:[#allocation5_spill] sm:$0xff] %v3951_v34  ;;  %v2652_v33 = vmul.f32 -1.442695, %v3951_v34 }
 0x1c7   : > { %v962_v49 = vpop.f32.mrf.mxu2 }
 0x1c8   : > { %v3953_v42 = vadd.f32 %v962_v49, %v886_v38  ;;  %2937 = vpow2.f32 %v2652_v33 }
 0x1ca   : > { %5862 = vst [vmem:[#allocation16_spill] sm:$0xff] %v3953_v42  ;;  %v2653_v53 = vmul.f32 -1.442695, %v3953_v42  ;;  %v2936_v48 = vpop.eup %2935 }
 0x1cb   : > { %v991_v7 = vpop.f32.mrf.mxu3  ;;  %v3969_v63 = vadd.f32 1.0, %v2936_v48 }
 0x1cc   : > { %v3956_v29 = vadd.f32 %v991_v7, %v886_v38  ;;  %2939 = vpow2.f32 %v2653_v53 }
 0x1cd   : > { %v1084_v40 = vand.u32 2147483648, %v3969_v63 }
 0x1ce   : > { %5863 = vst [vmem:[#allocation10_spill] sm:$0xff] %v3956_v29  ;;  %v2654_v11 = vmul.f32 -1.442695, %v3956_v29  ;;  %v2938_v24 = vpop.eup %2937 }
 0x1cf   : > { %v965_v17 = vpop.f32.mrf.mxu2  ;;  %v3971_v9 = vadd.f32 1.0, %v2938_v24  ;;  %v4028_v38 = vor.u32 1.1754944e-38, %v1084_v40 }
 0x1d0   : > { %v3959_v20 = vadd.f32 %v965_v17, %v891_v61  ;;  %2941 = vpow2.f32 %v2654_v11 }
 0x1d1   : > { %5874 = vst [vmem:[#allocation3_spill] sm:$0xff] %v4028_v38 }
 0x1d2   : > { %5864 = vst [vmem:[#allocation13_spill] sm:$0xff] %v3959_v20  ;;  %v2655_v41 = vmul.f32 -1.442695, %v3959_v20  ;;  %v2940_v12 = vpop.eup %2939 }
 0x1d3   : > { %v994_v51 = vpop.f32.mrf.mxu3  ;;  %v3974_v14 = vadd.f32 1.0, %v2940_v12 }
 0x1d4   : > { %v3961_v45 = vadd.f32 %v994_v51, %v891_v61  ;;  %2943 = vpow2.f32 %v2655_v41 }
 0x1d5   : > { %v1114_v11 = vand.u32 2147483648, %v3974_v14 }
 0x1d6   : > { %5865 = vst [vmem:[#allocation9_spill] sm:$0xff] %v3961_v45  ;;  %v2656_v21 = vmul.f32 -1.442695, %v3961_v45  ;;  %v2942_v2 = vpop.eup %2941 }
 0x1d7   : > { %v967_v44 = vpop.f32.mrf.mxu2  ;;  %v3979_v57 = vadd.f32 1.0, %v2942_v2 }
 0x1d8   : > { %2945 = vpow2.f32 %v2656_v21  ;;  %v3967_v46 = vadd.f32 %v967_v44, %v896_v25 }
 0x1d9   : > { %2947 = vrcp.f32 %v3969_v63 }
 0x1da   : > { %5866 = vst [vmem:[#allocation11_spill] sm:$0xff] %v3967_v46  ;;  %v2944_v60 = vpop.eup %2943  ;;  %v2657_v26 = vmul.f32 -1.442695, %v3967_v46  ;;  %2949 = vrcp.f32 %v3971_v9 }
 0x1db   : > { %v996_v62 = vpop.f32.mrf.mxu3  ;;  %v3984_v47 = vadd.f32 1.0, %v2944_v60 }
 0x1dc   : > { %v3976_v10 = vadd.f32 %v996_v62, %v896_v25  ;;  %2951 = vpow2.f32 %v2657_v26 }
 0x1dd   : > { %2953 = vrcp.f32 %v3974_v14  ;;  %vm1138_vm13 = vweird.f32 %v3984_v47 }
 0x1de   : > { %v2946_v6 = vpop.eup %2945  ;;  %5867 = vst [vmem:[#allocation12_spill] sm:$0xff] %v3976_v10  ;;  %v2658_v58 = vmul.f32 -1.442695, %v3976_v10  ;;  %2955 = vrcp.f32 %v3979_v57 }
 0x1df   : > { %v970_v56 = vpop.f32.mrf.mxu2  ;;  %v3988_v19 = vadd.f32 1.0, %v2946_v6  ;;  %2957 = vrcp.f32 %v3984_v47  ;;  %v3999_v15 = vpop.eup %2947 }
 0x1e0   : > { %v3981_v13 = vadd.f32 %v970_v56, %v901_v1  ;;  %v4002_v0 = vpop.eup %2949  ;;  %v1074_v8 = vmul.f32 %v3999_v15, %v3969_v63 }
 0x1e1   : > { %5870 = vst [vmem:[#allocation8_spill] sm:$0xff] %v3988_v19  ;;  %2959 = vrcp.f32 %v3988_v19  ;;  %vm1153_vm14 = vweird.f32 %v3988_v19 }
 0x1e2   : > { %5868 = vst [vmem:[#allocation14_spill] sm:$0xff] %v3981_v13  ;;  %v2659_v50 = vmul.f32 -1.442695, %v3981_v13  ;;  %2961 = vpow2.f32 %v2658_v58  ;;  %v2952_v43 = vpop.eup %2951  ;;  %v1075_v51 = vsub.f32 1.0, %v1074_v8  ;;  %v4054_v58 = vor.u32 1.1754944e-38, %v1114_v11 }
 0x1e3   : > { %v999_v37 = vpop.f32.mrf.mxu3  ;;  %5871 = vst [vmem:[#allocation2_spill] sm:$0xff] %v4002_v0  ;;  %v4008_v59 = vpop.eup %2953  ;;  %v4017_v16 = vadd.f32 1.0, %v2952_v43 }
 0x1e4   : > { %v3986_v4 = vadd.f32 %v999_v37, %v901_v1  ;;  %2963 = vpow2.f32 %v2659_v50  ;;  %v4010_v36 = vpop.eup %2955  ;;  %v1104_v53 = vmul.f32 %v4008_v59, %v3974_v14  ;;  %v1076_v2 = vmul.f32 %v3999_v15, %v1075_v51  ;;  %5875 = vst [vmem:[#allocation17_spill] sm:$0xff] %v4054_v58 }
 0x1e5   : > { %v4015_v18 = vpop.eup %2957  ;;  %v1119_v24 = vmul.f32 %v4010_v36, %v3979_v57  ;;  %v1129_v50 = vand.u32 2147483648, %v3979_v57  ;;  %vm1168_vm6 = vweird.f32 %v4017_v16 }
 0x1e6   : > { %5869 = vst [vmem:[#allocation4_spill] sm:$0xff] %v3986_v4  ;;  %v2660_v39 = vmul.f32 -1.442695, %v3986_v4  ;;  %v1134_v22 = vmul.f32 %v4015_v18, %v3984_v47  ;;  %vm1139_vm12 = vweird.f32 %v4015_v18 }
 0x1e7   : > { %v972_v31 = vpop.f32.mrf.mxu2  ;;  %5872 = vst [vmem:[#allocation7_spill] sm:$0xff] %v4015_v18  ;;  %v4022_v49 = vpop.eup %2959  ;;  %v1120_v43 = vsub.f32 1.0, %v1119_v24  ;;  %v4073_v51 = vor.u32 1.1754944e-38, %v1129_v50  ;;  %vm4122_vm3 = vmor %vm1138_vm13, %vm1139_vm12 }
 0x1e8   : > { %v3993_v52 = vadd.f32 %v972_v31, %v3947_v5  ;;  %2965 = vpow2.f32 %v2660_v39  ;;  %5873 = vst [vmem:[#allocation6_spill] sm:$0xff] %v4022_v49  ;;  %v2962_v7 = vpop.eup %2961  ;;  %v1135_v60 = vsub.f32 1.0, %v1134_v22  ;;  %v1149_v26 = vmul.f32 %v4022_v49, %v3988_v19 }
 0x1e9   : > { %v4039_v56 = vadd.f32 1.0, %v2962_v7  ;;  %v1105_v31 = vsub.f32 1.0, %v1104_v53  ;;  %v1144_v39 = vand.u32 2147483648, %v3984_v47  ;;  %5877 = vst [vmem:[#allocation19_spill] sm:$0xff] %v4073_v51  ;;  %vm1154_vm2 = vweird.f32 %v4022_v49 }
 0x1ea   : > { %v2661_v28 = vmul.f32 -1.442695, %v3993_v52  ;;  %v2964_v54 = vpop.eup %2963  ;;  %v1150_v7 = vsub.f32 1.0, %v1149_v26  ;;  %vm4156_vm8 = vmor %vm1153_vm14, %vm1154_vm2  ;;  %v5886_v22 = vmov 0 }
 0x1eb   : > { %v1001_v32 = vpop.f32.mrf.mxu3  ;;  %v4044_v37 = vadd.f32 1.0, %v2964_v54  ;;  %v1106_v54 = vmul.f32 %v4008_v59, %v1105_v31  ;;  %v4080_v53 = vor.u32 1.1754944e-38, %v1144_v39  ;;  %v5887_v22 = vsel %vm4156_vm8, 4294967295, %v5886_v22 }
 0x1ec   : > { %v4006_v23 = vadd.f32 %v1001_v32, %v3947_v5  ;;  %2967 = vpow2.f32 %v2661_v28  ;;  %v1089_v5 = vmul.f32 %v4002_v0, %v3971_v9  ;;  %v1151_v26 = vmul.f32 %v4022_v49, %v1150_v7  ;;  %5888 = vst [vmem:[#allocation26_spill] sm:$0xff] %v5887_v22 }
 0x1ed   : > { %2969 = vrcp.f32 %v4017_v16  ;;  %5879 = vst [vmem:[#allocation21_spill] sm:$0xff] %v4080_v53  ;;  %v4103_v39 = vadd.f32 %v4008_v59, %v1106_v54  ;;  %v5882_v54 = vmov 0  ;;  %v1204_v34 = vand.u32 2147483648, %v4044_v37 }
 0x1ee   : > { %v2662_v61 = vmul.f32 -1.442695, %v4006_v23  ;;  %v2966_v33 = vpop.eup %2965  ;;  %v1090_v41 = vsub.f32 1.0, %v1089_v5  ;;  %v4068_v5 = vadd.f32 %v3999_v15, %v1076_v2  ;;  %v5883_v54 = vsel %vm4122_vm3, 4294967295, %v5882_v54 }
 0x1ef   : > { %v975_v3 = vpop.f32.mrf.mxu2  ;;  %v4052_v6 = vadd.f32 1.0, %v2966_v33  ;;  %5884 = vst [vmem:[#allocation24_spill] sm:$0xff] %v5883_v54  ;;  %vm1198_vm1 = vweird.f32 %v4044_v37  ;;  %v4184_v38 = vor.u32 1.1754944e-38, %v1204_v34  ;;  %v5889_v34 = vmov 0 }
 0x1f0   : > { %v4020_v55 = vadd.f32 %v975_v3, %v3943_v30  ;;  %2971 = vpow2.f32 %v2662_v61  ;;  %v1091_v32 = vmul.f32 %v4002_v0, %v1090_v41  ;;  %5876 = vst [vmem:[#allocation18_spill] sm:$0xff] %v4068_v5  ;;  %v1136_v61 = vmul.f32 %v4015_v18, %v1135_v60 }
 0x1f1   : > { %vm1213_vm15 = vweird.f32 %v4052_v6 }
 0x1f2   : > { %v2663_v62 = vmul.f32 -1.442695, %v4020_v55  ;;  %v2968_v48 = vpop.eup %2967  ;;  %v4078_v33 = vadd.f32 %v4002_v0, %v1091_v32  ;;  %v4092_v60 = vadd.f32 %v4015_v18, %v1136_v61 }
 0x1f3   : > { %v1004_v44 = vpop.f32.mrf.mxu3  ;;  %v4062_v28 = vpop.eup %2969 }
 0x1f4   : > { %v4047_v12 = vadd.f32 %v1004_v44, %v3943_v30  ;;  %2973 = vpow2.f32 %v2663_v62  ;;  %v4060_v30 = vadd.f32 1.0, %v2968_v48  ;;  %5878 = vst [vmem:[#allocation20_spill] sm:$0xff] %v4078_v33  ;;  %v1164_v11 = vmul.f32 %v4062_v28, %v4017_v16 }
 0x1f5   : > { %2975 = vrcp.f32 %v4039_v56  ;;  %v1121_v48 = vmul.f32 %v4010_v36, %v1120_v43  ;;  %5880 = vst [vmem:[#allocation22_spill] sm:$0xff] %v4092_v60  ;;  %vm1169_vm7 = vweird.f32 %v4062_v28 }
 0x1f6   : > { %2977 = vrcp.f32 %v4044_v37  ;;  %v2664_v8 = vmul.f32 -1.442695, %v4047_v12  ;;  %v2972_v40 = vpop.eup %2971  ;;  %v1165_v7 = vsub.f32 1.0, %v1164_v11  ;;  %v1232_v51 = vand.u32 2147483647, %v4060_v30  ;;  %vm4196_vm9 = vmor %vm1168_vm6, %vm1169_vm7 }
 0x1f7   : > { %2979 = vrcp.f32 %v4052_v6  ;;  %v977_v44 = vpop.f32.mrf.mxu2  ;;  %v4087_v24 = vadd.f32 1.0, %v2972_v40  ;;  %v5890_v34 = vsel %vm4196_vm9, 4294967295, %v5889_v34  ;;  %vm1228_vm11 = vweird.f32 %v4060_v30 }
 0x1f8   : > { %2981 = vrcp.f32 %v4060_v30  ;;  %v4098_v50 = vadd.f32 %v977_v44, %v3945_v27  ;;  %v1174_v44 = vand.u32 2147483648, %v4017_v16  ;;  %v1234_v33 = vand.u32 2147483648, %v4060_v30 }
 0x1f9   : > { %2983 = vpow2.f32 %v2664_v8  ;;  %v1249_v58 = vand.u32 2147483648, %v4087_v24 }
 0x1fa   : > { %v2974_v41 = vpop.eup %2973  ;;  %v2665_v21 = vmul.f32 -1.442695, %v4098_v50  ;;  %v4148_v25 = vor.u32 1.1754944e-38, %v1174_v44 }
 0x1fb   : > { %v1006_v62 = vpop.f32.mrf.mxu3  ;;  %v4089_v2 = vpop.eup %2975  ;;  %v4095_v31 = vadd.f32 1.0, %v2974_v41  ;;  %v4116_v41 = vadd.f32 %v4010_v36, %v1121_v48  ;;  %v4137_v48 = vadd.f32 %v4022_v49, %v1151_v26  ;;  %v4263_v53 = vor.u32 1.1754944e-38, %v1249_v58 }
 0x1fc   : > { %v4100_v32 = vpop.eup %2977  ;;  %v4108_v8 = vadd.f32 %v1006_v62, %v3945_v27  ;;  %v1179_v27 = vmul.f32 %v4089_v2, %v4039_v56  ;;  %v1166_v62 = vmul.f32 %v4062_v28, %v1165_v7 }
 0x1fd   : > { %v4110_v40 = vpop.eup %2979  ;;  %2985 = vrcp.f32 %v4095_v31  ;;  %5881 = vst [vmem:[#allocation23_spill] sm:$0xff] %v4116_v41  ;;  %v1194_v1 = vmul.f32 %v4100_v32, %v4044_v37  ;;  %vm1199_vm10 = vweird.f32 %v4100_v32  ;;  %vm1258_vm2 = vweird.f32 %v4095_v31 }
 0x1fe   : > { %2987 = vrcp.f32 %v4087_v24  ;;  %v4130_v11 = vpop.eup %2981  ;;  %5885 = vst [vmem:[#allocation25_spill] sm:$0xff] %v4137_v48  ;;  %v1209_v61 = vmul.f32 %v4110_v40, %v4052_v6  ;;  %v2666_v3 = vmul.f32 -1.442695, %v4108_v8  ;;  %v1180_v43 = vsub.f32 1.0, %v1179_v27  ;;  %vm4242_vm13 = vmor %vm1198_vm1, %vm1199_vm10 }
 0x1ff   : > { %v2984_v17 = vpop.eup %2983  ;;  %2989 = vpow2.f32 %v2665_v21  ;;  %v1224_v35 = vmul.f32 %v4130_v11, %v4060_v30  ;;  %v1195_v44 = vsub.f32 1.0, %v1194_v1  ;;  %v4177_v45 = vadd.f32 %v4062_v28, %v1166_v62 }
 0x200   : > { %v4150_v26 = vadd.f32 1.0, %v2984_v17  ;;  %2991 = vpow2.f32 %v2666_v3  ;;  %v1210_v42 = vsub.f32 1.0, %v1209_v61  ;;  %v1219_v3 = vand.u32 2147483648, %v4052_v6 }
 0x201   : > { %v1181_v21 = vmul.f32 %v4089_v2, %v1180_v43  ;;  %v1225_v27 = vsub.f32 1.0, %v1224_v35  ;;  %v1196_v20 = vmul.f32 %v4100_v32, %v1195_v44  ;;  %vm1214_vm0 = vweird.f32 %v4110_v40 }
 0x202   : > { %2993 = vrcp.f32 %v4150_v26  ;;  %v1211_v35 = vmul.f32 %v4110_v40, %v1210_v42  ;;  %v4202_v43 = vor.u32 1.1754944e-38, %v1219_v3  ;;  %vm1229_vm12 = vweird.f32 %v4130_v11  ;;  %vm4258_vm14 = vmor %vm1213_vm15, %vm1214_vm0 }
 0x203   : > { %v4163_v7 = vpop.eup %2985  ;;  %v4217_v42 = vadd.f32 %v4089_v2, %v1181_v21  ;;  %v1226_v3 = vmul.f32 %v4130_v11, %v1225_v27  ;;  %v4224_v49 = vadd.f32 %v4100_v32, %v1196_v20  ;;  %v1262_v21 = vand.u32 2147483647, %v4095_v31  ;;  %vm4285_vm15 = vmor %vm1228_vm11, %vm1229_vm12 }
 0x204   : > { %v4171_v29 = vpop.eup %2987  ;;  %v1254_v1 = vmul.f32 %v4163_v7, %v4095_v31  ;;  %v1277_v58 = vand.u32 2147483647, %v4150_v26  ;;  %vm4289_vm10 = vcmp.eq.f32.partialorder %v1232_v51, 8.507059e+37  ;;  %vm1259_vm0 = vweird.f32 %v4163_v7 }
 0x205   : > { %v2990_v61 = vpop.eup %2989  ;;  %v1239_v17 = vmul.f32 %v4171_v29, %v4087_v24  ;;  %v4247_v5 = vadd.f32 %v4130_v11, %v1226_v3  ;;  %vm4274_vm1 = vcmp.eq.f32.partialorder %v1262_v21, 8.507059e+37  ;;  %vm4331_vm6 = vmor %vm1258_vm2, %vm1259_vm0  ;;  %vm5919_vm9 = vweird.f32 %v4171_v29 }
 0x206   : > { %v2992_v10 = vpop.eup %2991  ;;  %v4205_v44 = vadd.f32 1.0, %v2990_v61  ;;  %v1255_v46 = vsub.f32 1.0, %v1254_v1  ;;  %v4233_v1 = vor.u32 1.1754944e-38, %v1234_v33  ;;  %v1247_v33 = vand.u32 2147483647, %v4087_v24 }
 0x207   : > { %v4214_v48 = vadd.f32 1.0, %v2992_v10  ;;  %v1240_v22 = vsub.f32 1.0, %v1239_v17  ;;  %v4229_v10 = vadd.f32 %v4110_v40, %v1211_v35  ;;  %v1264_v17 = vand.u32 2147483648, %v4095_v31  ;;  %v5962_v35 = vld [vmem:[#allocation22_spill] sm:$0xff] }
 0x208   : > { %v4207_v62 = vpop.eup %2993  ;;  %2995 = vrcp.f32 %v4205_v44  ;;  %v1256_v20 = vmul.f32 %v4163_v7, %v1255_v46  ;;  %v1231_v30 = vsel %vm4285_vm15, %v4130_v11, %v4247_v5  ;;  %vm4302_vm11 = vcmp.eq.f32.partialorder %v1247_v33, 8.507059e+37 }
 0x209   : > { %v1269_v61 = vmul.f32 %v4207_v62, %v4150_v26  ;;  %2997 = vrcp.f32 %v4214_v48  ;;  %v1241_v3 = vmul.f32 %v4171_v29, %v1240_v22  ;;  %v1265_v54 = vor.u32 1.1754944e-38, %v1264_v17 }
 0x20a   : > { %v1257_v21 = vadd.f32 %v4163_v7, %v1256_v20  ;;  %v5903_v17 = vand.u32 2147483647, %v4044_v37  ;;  %vm1273_vm15 = vweird.f32 %v4150_v26  ;;  %v1279_v5 = vand.u32 2147483648, %v4150_v26 }
 0x20b   : > { %v1270_v27 = vsub.f32 1.0, %v1269_v61  ;;  %v1242_v18 = vadd.f32 %v4171_v29, %v1241_v3  ;;  %v5906_v33 = vand.u32 2147483647, %v4052_v6  ;;  %vm4335_vm12 = vcmp.eq.f32.partialorder %v1277_v58, 8.507059e+37 }
 0x20c   : > { %vm4313_vm5 = vcmp.eq.f32.partialorder %v5903_v17, 8.507059e+37  ;;  %v1294_v6 = vand.u32 2147483648, %v4205_v44  ;;  %v5913_v17 = vand.u32 2147483647, %v4017_v16  ;;  %v5914_v31 = vmov 0 }
 0x20d   : > { %v1271_v61 = vmul.f32 %v4207_v62, %v1270_v27  ;;  %vm4323_vm7 = vcmp.eq.f32.partialorder %v5906_v33, 8.507059e+37  ;;  %v1261_v58 = vsel %vm4331_vm6, %v4163_v7, %v1257_v21  ;;  %vm5916_vm2 = vweird.f32 %v4207_v62 }
 0x20e   : > { %v4266_v60 = vpop.eup %2995  ;;  %vm4345_vm3 = vcmp.eq.f32.partialorder %v5913_v17, 8.507059e+37  ;;  %vm4354_vm0 = vmor %vm1273_vm15, %vm5916_vm2  ;;  %v1309_v16 = vand.u32 2147483648, %v4214_v48  ;;  %vm5920_vm6 = vweird.f32 %v4087_v24  ;;  %v1307_v37 = vand.u32 2147483647, %v4214_v48  ;;  %v5973_v24 = vld [vmem:[#allocation26_spill] sm:$0xff] }
 0x20f   : > { %v4279_v22 = vpop.eup %2997  ;;  %v1284_v41 = vmul.f32 %v4266_v60, %v4205_v44  ;;  %v1272_v13 = vadd.f32 %v4207_v62, %v1271_v61  ;;  %v5907_v61 = vmov 0  ;;  %v5915_v31 = vsel %vm4345_vm3, 4294967295, %v5914_v31 }
 0x210   : > { %v1299_v20 = vmul.f32 %v4279_v22, %v4214_v48  ;;  %v5908_v61 = vsel %vm4323_vm7, 4294967295, %v5907_v61  ;;  %vm1289_vm4 = vweird.f32 %v4266_v60  ;;  %vm1123_vm3 = vweird.f32 %v3979_v57  ;;  %vm4367_vm7 = vmor %vm5920_vm6, %vm5919_vm9 }
 0x211   : > { %v1285_v11 = vsub.f32 1.0, %v1284_v41  ;;  %v1292_v41 = vand.u32 2147483647, %v4205_v44  ;;  %v1276_v21 = vsel %vm4354_vm0, %v4207_v62, %v1272_v13  ;;  %vm1304_vm15 = vweird.f32 %v4279_v22 }
 0x212   : > { %v1300_v26 = vsub.f32 1.0, %v1299_v20  ;;  %v5923_v17 = vand.u32 2147483647, %v3984_v47  ;;  %v1246_v0 = vsel %vm4367_vm7, %v4171_v29, %v1242_v18  ;;  %v1280_v33 = vor.u32 1.1754944e-38, %v1279_v5 }
 0x213   : > { %v1286_v20 = vmul.f32 %v4266_v60, %v1285_v11  ;;  %vm1288_vm9 = vweird.f32 %v4205_v44  ;;  %v1266_v62 = vsel %vm4274_vm1, %v1265_v54, %v1261_v58  ;;  %v1295_v47 = vor.u32 1.1754944e-38, %v1294_v6 }
 0x214   : > { %v1301_v11 = vmul.f32 %v4279_v22, %v1300_v26  ;;  %vm4380_vm8 = vcmp.eq.f32.partialorder %v5923_v17, 8.507059e+37  ;;  %vm1290_vm6 = vmor %vm1288_vm9, %vm1289_vm4  ;;  %vm1303_vm2 = vweird.f32 %v4214_v48  ;;  %v5926_v29 = vand.u32 2147483647, %v3974_v14  ;;  %v5968_v17 = vld [vmem:[#allocation2_spill] sm:$0xff]  ;;  %v5991_v48 = vld [vmem:[#allocation15_spill] sm:$0xff] }
 0x215   : > { %v1287_v13 = vadd.f32 %v4266_v60, %v1286_v20  ;;  %v1281_v44 = vsel %vm4335_vm12, %v1280_v33, %v1276_v21  ;;  %vm1293_vm1 = vcmp.eq.f32.partialorder %v1292_v41, 8.507059e+37  ;;  %vm1305_vm4 = vmor %vm1303_vm2, %vm1304_vm15  ;;  %v1310_v54 = vor.u32 1.1754944e-38, %v1309_v16  ;;  %v5966_v21 = vld [vmem:[#allocation4_spill] sm:$0xff] }
 0x216   : > { %v1302_v26 = vadd.f32 %v4279_v22, %v1301_v11  ;;  %vm4398_vm7 = vcmp.eq.f32.partialorder %v5926_v29, 8.507059e+37  ;;  %v5929_v5 = vand.u32 2147483647, %v3979_v57  ;;  %v1236_v6 = vsel %vm4289_vm10, %v4233_v1, %v1231_v30  ;;  %v5958_v57 = vld [vmem:[#allocation23_spill] sm:$0xff] }
 0x217   : > { %v1291_v46 = vsel %vm1290_vm6, %v4266_v60, %v1287_v13  ;;  %vm1308_vm12 = vcmp.eq.f32.partialorder %v1307_v37, 8.507059e+37  ;;  %vm5932_vm6 = vweird.f32 %v4089_v2  ;;  %vm5933_vm0 = vweird.f32 %v4039_v56  ;;  %v5967_v37 = vld [vmem:[#allocation18_spill] sm:$0xff]  ;;  %v5978_v29 = vld [vmem:[#allocation11_spill] sm:$0xff] }
 0x218   : > { %vm4409_vm9 = vcmp.eq.f32.partialorder %v5929_v5, 8.507059e+37  ;;  %v1296_v58 = vsel %vm1293_vm1, %v1295_v47, %v1291_v46  ;;  %v1306_v3 = vsel %vm1305_vm4, %v4279_v22, %v1302_v26  ;;  %vm4421_vm15 = vmor %vm5933_vm0, %vm5932_vm6  ;;  %v1251_v41 = vsel %vm4302_vm11, %v4263_v53, %v1246_v0  ;;  %v5975_v13 = vld [vmem:[#allocation6_spill] sm:$0xff]  ;;  %v5980_v5 = vld [vmem:[#allocation17_spill] sm:$0xff] }
 0x219   : > { %v1325_v20 = vmul.f32 %v1266_v62, %v4020_v55  ;;  %v1327_v1 = vmul.f32 %v1296_v58, %v4098_v50  ;;  %v1311_v27 = vsel %vm1308_vm12, %v1310_v54, %v1306_v3  ;;  %v1186_v22 = vsel %vm4421_vm15, %v4089_v2, %v4217_v42  ;;  %v5959_v42 = vld [vmem:[#allocation24_spill] sm:$0xff]  ;;  %v5976_v62 = vld [vmem:[#allocation25_spill] sm:$0xff] }
 0x21a   : > { %v5936_v30 = vsel %vm4242_vm13, %v4100_v32, %v4224_v49  ;;  %v1326_v0 = vmul.f32 %v1281_v44, %v4047_v12  ;;  %v1328_v55 = vmul.f32 %v1311_v27, %v4108_v8  ;;  %v5937_v53 = vand.u32 2147483648, %v4039_v56  ;;  %v5979_v54 = vld [vmem:[#allocation20_spill] sm:$0xff]  ;;  %v5984_v27 = vld [vmem:[#allocation19_spill] sm:$0xff] }
 0x21b   : > { %v1206_v51 = vsel %vm4313_vm5, %v4184_v38, %v5936_v30  ;;  %v5938_v2 = vsel %vm4258_vm14, %v4110_v40, %v4229_v10  ;;  %vm5939_vm10 = vnez %v5908_v61  ;;  %v1323_v32 = vmul.f32 %v1236_v6, %v3993_v52  ;;  %v5961_v10 = vld [vmem:[#allocation7_spill] sm:$0xff]  ;;  %v5981_v58 = vld [vmem:[#allocation12_spill] sm:$0xff]  ;;  %v5985_v30 = vld [vmem:[#allocation13_spill] sm:$0xff] }
 0x21c   : > { %v1190_v50 = vor.u32 1.1754944e-38, %v5937_v53  ;;  %v1221_v49 = vsel %vm5939_vm10, %v4202_v43, %v5938_v2  ;;  %v1344_v19 = vpack.c.bf16 %v1327_v1, %v1325_v20  ;;  %vm5940_vm5 = vweird.f32 %v4008_v59  ;;  %v5953_v43 = vld [vmem:[#allocation14_spill] sm:$0xff]  ;;  %v5988_v53 = vld [vmem:[#allocation9_spill] sm:$0xff]  ;;  %v5989_v2 = vld [vmem:[#allocation16_spill] sm:$0xff] }
 0x21d   : > { %vm5941_vm13 = vweird.f32 %v3974_v14  ;;  %vm5944_vm2 = vnez %v5890_v34  ;;  %vm5946_vm14 = vnez %v5915_v31  ;;  %v5947_v52 = vand.u32 2147483647, %v4039_v56  ;;  %v5964_v31 = vld [vmem:[#allocation21_spill] sm:$0xff] }
 0x21e   : > { %vm4459_vm11 = vmor %vm5941_vm13, %vm5940_vm5  ;;  %v5945_v4 = vsel %vm5944_vm2, %v4062_v28, %v4177_v45  ;;  %v1324_v8 = vmul.f32 %v1251_v41, %v4006_v23  ;;  %v1345_v40 = vpack.c.bf16 %v1328_v55, %v1326_v0  ;;  %vm5948_vm1 = vweird.f32 %v4010_v36  ;;  %1431 = vmatpush.bf16.msrb.mxu2 %v1344_v19  ;;  %v5986_v0 = vld [vmem:[#allocation3_spill] sm:$0xff]  ;;  %v5990_v19 = vld [vmem:[#allocation10_spill] sm:$0xff] }
 0x21f   : > { %v1176_v12 = vsel %vm5946_vm14, %v4148_v25, %v5945_v4  ;;  %vm1188_vm0 = vcmp.eq.f32.partialorder %v5947_v52, 8.507059e+37  ;;  %v1111_v14 = vsel %vm4459_vm11, %v4008_v59, %v4103_v39  ;;  %vm4482_vm4 = vmor %vm1123_vm3, %vm5948_vm1  ;;  %v5951_v25 = vld [vmem:[#allocation8_spill] sm:$0xff]  ;;  %v1321_v23 = vmul.f32 %v1206_v51, %v5953_v43  ;;  %v5992_v52 = vld [vmem:[#allocation5_spill] sm:$0xff] }
 0x220   : > { %v5952_v28 = vand.u32 2147483648, %v5951_v25  ;;  %v1191_v34 = vsel %vm1188_vm0, %v1190_v50, %v1186_v22  ;;  %vm5954_vm12 = vweird.f32 %v3999_v15  ;;  %vm5955_vm6 = vweird.f32 %v3969_v63  ;;  %1460 = vmatpush.bf16.msrb.mxu3 %v1345_v40  ;;  %v2848_v45 = vld [vmem:[%s5704_s3 + $0x28] sm:$0xff] }
 0x221   : > { %vm4493_vm15 = vmor %vm5955_vm6, %vm5954_vm12  ;;  %v1126_v39 = vsel %vm4482_vm4, %v4010_v36, %v5958_v57  ;;  %vm5960_vm3 = vnez %v5959_v42  ;;  %v5965_v7 = vand.u32 2147483647, %v5951_v25  ;;  %v1322_v11 = vmul.f32 %v1221_v49, %v5966_v21  ;;  %v2849_v25 = vld [vmem:[%s5704_s3 + $0x30] sm:$0xff] }
 0x222   : > { %v1160_v56 = vor.u32 1.1754944e-38, %v5952_v28  ;;  %v5963_v61 = vsel %vm5960_vm3, %v5961_v10, %v5962_v35  ;;  %v1081_v36 = vsel %vm4493_vm15, %v3999_v15, %v5967_v37  ;;  %vm5969_vm5 = vweird.f32 %v5968_v17  ;;  %v2850_v28 = vld [vmem:[%s5704_s3 + $0x38] sm:$0xff] }
 0x223   : > { %v1146_v16 = vsel %vm4380_vm8, %v5964_v31, %v5963_v61  ;;  %vm1158_vm10 = vcmp.eq.f32.partialorder %v5965_v7, 8.507059e+37  ;;  %vm5970_vm13 = vweird.f32 %v3971_v9  ;;  %vm5974_vm8 = vnez %v5973_v24 }
 0x224   : > { %vm4520_vm11 = vmor %vm5970_vm13, %vm5969_vm5  ;;  %v5977_v47 = vsel %vm5974_vm8, %v5975_v13, %v5976_v62  ;;  %v1319_v44 = vmul.f32 %v1176_v12, %v5978_v29  ;;  %v1342_v46 = vpack.c.bf16 %v1323_v32, %v1321_v23  ;;  %v1116_v6 = vsel %vm4398_vm7, %v5980_v5, %v1111_v14 }
 0x225   : > { %v1161_v26 = vsel %vm1158_vm10, %v1160_v56, %v5977_v47  ;;  %v1096_v15 = vsel %vm4520_vm11, %v5968_v17, %v5979_v54  ;;  %v1320_v3 = vmul.f32 %v1191_v34, %v5981_v58  ;;  %v1343_v60 = vpack.c.bf16 %v1324_v8, %v1322_v11  ;;  %v4574_v56 = vpop.permute.xlu1 %1387  ;;  %v4576_v34 = vpop.permute.xlu2 %1392 }
 0x226   : > { %v5982_v41 = vand.u32 2147483647, %v3969_v63  ;;  %v5983_v20 = vand.u32 2147483648, %v3971_v9  ;;  %v1131_v22 = vsel %vm4409_vm9, %v5984_v27, %v1126_v39  ;;  %v1317_v51 = vmul.f32 %v1146_v16, %v5985_v30  ;;  %1432 = vmatpush.bf16.msrb.mxu2 %v1342_v46  ;;  %v1378_v16 = vpop.permute.xlu0 %1377 }
 0x227   : > { %v5987_v18 = vand.u32 2147483647, %v3971_v9  ;;  %v1318_v50 = vmul.f32 %v1161_v26, %v5988_v53  ;;  %1461 = vmatpush.bf16.msrb.mxu3 %v1343_v60  ;;  %v1315_v49 = vmul.f32 %v1116_v6, %v5989_v2  ;;  %v1316_v38 = vmul.f32 %v1131_v22, %v5990_v19  ;;  %v2847_v9 = vld [vmem:[%s5704_s3 + $0x20] sm:$0xff] }
 0x228   : > { %vm1083_vm2 = vcmp.eq.f32.partialorder %v5982_v41, 8.507059e+37  ;;  %v1100_v1 = vor.u32 1.1754944e-38, %v5983_v20  ;;  %v1340_v32 = vpack.c.bf16 %v1319_v44, %v1317_v51  ;;  %vm5993_vm9 = vcmask 523264  }
 0x229   : > { %v1086_v55 = vsel %vm1083_vm2, %v5986_v0, %v1081_v36  ;;  %vm1098_vm7 = vcmp.eq.f32.partialorder %v5987_v18, 8.507059e+37  ;;  %v1341_v4 = vpack.c.bf16 %v1320_v3, %v1318_v50  ;;  %vm5994_vm14 = vmmov %vm5993_vm9 }
 0x22a   : > { %v1101_v63 = vsel %vm1098_vm7, %v1100_v1, %v1096_v15  ;;  %v1313_v12 = vmul.f32 %v1086_v55, %v5991_v48  ;;  %1433 = vmatpush.bf16.msrb.mxu2 %v1340_v32  ;;  %vm5995_vm0 = vmmov %vm5993_vm9 }
 0x22b   : > { %v1314_v8 = vmul.f32 %v1101_v63, %v5992_v52  ;;  %1462 = vmatpush.bf16.msrb.mxu3 %v1341_v4  ;;  %vm5996_vm1 = vmmov %vm5995_vm0 }
 0x22c   : > { %v1338_v40 = vpack.c.bf16 %v1315_v49, %v1313_v12  ;;  %vm5997_vm4 = vmmov %vm5995_vm0 }
 0x22d   : > { %v1339_v14 = vpack.c.bf16 %v1316_v38, %v1314_v8  ;;  %vm5998_vm12 = vmmov %vm5995_vm0  ;;  %v4578_v43 = vpop.permute.xlu1 %1382  ;;  %v1368_v57 = vpop.permute.xlu2 %1367 }
 0x22e   : > { %1434 = vmatpush.bf16.msrb.mxu2 %v1338_v40  ;;  %vm5999_vm6 = vmmov %vm5995_vm0  ;;  %v1373_v29 = vpop.permute.xlu0 %1372 }
 0x22f   : > { %1463 = vmatpush.bf16.msrb.mxu3 %v1339_v14  ;;  %vm6000_vm15 = vmmov %vm5995_vm0 }
 0x231   : > { %2699 = vmatmul.msk.bf16.vlgmr.msrb.gmra.mxu2 %vm5993_vm9, %v2847_v9 }
 0x232   : > { %2703 = vmatmul.msk.bf16.vlgmr.msrb.gmra.mxu3 %vm5994_vm14, %v2847_v9 }
 0x235   : > { %v1358_v42 = vpop.permute.xlu1 %1357  ;;  %v1363_v21 = vpop.permute.xlu2 %1362 }
 0x241   : > { %2700 = vmatmul.msk.bf16.gmra.mxu2 %vm5995_vm0, %v2848_v45 }
 0x242   : > { %2704 = vmatmul.msk.bf16.gmra.mxu3 %vm5996_vm1, %v2848_v45 }
 0x251   : > { %2701 = vmatmul.msk.bf16.gmra.mxu2 %vm5997_vm4, %v2849_v25 }
 0x252   : > { %2705 = vmatmul.msk.bf16.gmra.mxu3 %vm5998_vm12, %v2849_v25 }
 0x261   : > { %2702 = vmatmul.msk.bf16.gmra.mxu2 %vm5999_vm6, %v2850_v28 }
 0x262   : > { %2706 = vmatmul.msk.bf16.gmra.mxu3 %vm6000_vm15, %v2850_v28 }
 0x2b4   : > { %v1436_v23 = vpop.f32.mrf.mxu2 }
 0x2b5   : > { %v1465_v59 = vpop.f32.mrf.mxu3  ;;  %v4580_v35 = vadd.f32 %v1436_v23, %v1358_v42 }
 0x2b6   : > { %v4583_v31 = vadd.f32 %v1465_v59, %v1358_v42 }
 0x2b7   : > { %6001 = vst [vmem:[#allocation8_spill] sm:$0xff] %v4580_v35  ;;  %v2707_v61 = vmul.f32 -1.442695, %v4580_v35 }
 0x2b8   : > { %6002 = vst [vmem:[#allocation14_spill] sm:$0xff] %v4583_v31  ;;  %v2708_v37 = vmul.f32 -1.442695, %v4583_v31 }
 0x2b9   : > { %2999 = vpow2.f32 %v2707_v61 }
 0x2ba   : > { %3001 = vpow2.f32 %v2708_v37 }
 0x2bc   : > { %v1438_v39 = vpop.f32.mrf.mxu2 }
 0x2bd   : > { %v1467_v10 = vpop.f32.mrf.mxu3  ;;  %v4586_v36 = vadd.f32 %v1438_v39, %v1363_v21 }
 0x2be   : > { %v4591_v13 = vadd.f32 %v1467_v10, %v1363_v21 }
 0x2bf   : > { %v2709_v33 = vmul.f32 -1.442695, %v4586_v36  ;;  %v3000_v24 = vpop.eup %2999 }
 0x2c0   : > { %6003 = vst [vmem:[#allocation23_spill] sm:$0xff] %v4591_v13  ;;  %v4594_v44 = vadd.f32 1.0, %v3000_v24  ;;  %v3002_v46 = vpop.eup %3001  ;;  %v2710_v54 = vmul.f32 -1.442695, %v4591_v13 }
 0x2c1   : > { %3003 = vpow2.f32 %v2709_v33  ;;  %v4600_v5 = vadd.f32 1.0, %v3002_v46 }
 0x2c2   : > { %vm1554_vm3 = vweird.f32 %v4594_v44  ;;  %v1560_v42 = vand.u32 2147483648, %v4594_v44 }
 0x2c4   : > { %v1441_v7 = vpop.f32.mrf.mxu2 }
 0x2c5   : > { %v1470_v11 = vpop.f32.mrf.mxu3  ;;  %v4588_v17 = vadd.f32 %v1441_v7, %v1368_v57 }
 0x2c6   : > { %v4602_v58 = vadd.f32 %v1470_v11, %v1368_v57 }
 0x2c7   : > { %v2711_v62 = vmul.f32 -1.442695, %v4588_v17  ;;  %v3004_v6 = vpop.eup %3003 }
 0x2c8   : > { %6004 = vst [vmem:[#allocation24_spill] sm:$0xff] %v4602_v58  ;;  %v4608_v27 = vadd.f32 1.0, %v3004_v6  ;;  %v2712_v22 = vmul.f32 -1.442695, %v4602_v58 }
 0x2c9   : > { %3005 = vpow2.f32 %v2711_v62 }
 0x2ca   : > { %3007 = vrcp.f32 %v4594_v44  ;;  %v1590_v7 = vand.u32 2147483648, %v4608_v27  ;;  %vm1584_vm5 = vweird.f32 %v4608_v27 }
 0x2cb   : > { %3009 = vpow2.f32 %v2710_v54  ;;  %v4670_v54 = vor.u32 1.1754944e-38, %v1560_v42 }
 0x2cc   : > { %v1443_v47 = vpop.f32.mrf.mxu2  ;;  %3011 = vrcp.f32 %v4600_v5 }
 0x2cd   : > { %v1472_v26 = vpop.f32.mrf.mxu3  ;;  %v4597_v15 = vadd.f32 %v1443_v47, %v1373_v29 }
 0x2ce   : > { %v4611_v30 = vadd.f32 %v1472_v26, %v1373_v29 }
 0x2cf   : > { %v2713_v3 = vmul.f32 -1.442695, %v4597_v15  ;;  %v3006_v20 = vpop.eup %3005 }
 0x2d0   : > { %6005 = vst [vmem:[#allocation7_spill] sm:$0xff] %v4611_v30  ;;  %v4614_v0 = vpop.eup %3007  ;;  %v4616_v55 = vadd.f32 1.0, %v3006_v20  ;;  %v2714_v63 = vmul.f32 -1.442695, %v4611_v30 }
 0x2d1   : > { %3013 = vpow2.f32 %v2713_v3  ;;  %v3010_v18 = vpop.eup %3009  ;;  %v1550_v50 = vmul.f32 %v4614_v0, %v4594_v44  ;;  %vm1555_vm10 = vweird.f32 %v4614_v0 }
 0x2d2   : > { %v4624_v49 = vpop.eup %3011  ;;  %v4626_v32 = vadd.f32 1.0, %v3010_v18  ;;  %vm4687_vm13 = vmor %vm1554_vm3, %vm1555_vm10  ;;  %vm1614_vm2 = vweird.f32 %v4616_v55 }
 0x2d3   : > { %v1551_v52 = vsub.f32 1.0, %v1550_v50  ;;  %v1565_v8 = vmul.f32 %v4624_v49, %v4600_v5 }
 0x2d4   : > { %v1446_v60 = vpop.f32.mrf.mxu2 }
 0x2d5   : > { %v1475_v41 = vpop.f32.mrf.mxu3  ;;  %v4605_v1 = vadd.f32 %v1446_v60, %v1378_v16  ;;  %v1552_v23 = vmul.f32 %v4614_v0, %v1551_v52  ;;  %v1566_v59 = vsub.f32 1.0, %v1565_v8  ;;  %v4680_v60 = vor.u32 1.1754944e-38, %v1590_v7 }
 0x2d6   : > { %v4619_v53 = vadd.f32 %v1475_v41, %v1378_v16 }
 0x2d7   : > { %v2715_v51 = vmul.f32 -1.442695, %v4605_v1  ;;  %v3014_v38 = vpop.eup %3013  ;;  %v4666_v26 = vadd.f32 %v4614_v0, %v1552_v23  ;;  %v1567_v29 = vmul.f32 %v4624_v49, %v1566_v59 }
 0x2d8   : > { %v2716_v4 = vmul.f32 -1.442695, %v4619_v53  ;;  %v4638_v14 = vadd.f32 1.0, %v3014_v38 }
 0x2d9   : > { %3015 = vpow2.f32 %v2715_v51 }
 0x2da   : > { %3017 = vrcp.f32 %v4608_v27  ;;  %vm1644_vm1 = vweird.f32 %v4638_v14 }
 0x2db   : > { %3019 = vpow2.f32 %v2712_v22 }
 0x2dc   : > { %v1448_v2 = vpop.f32.mrf.mxu2  ;;  %3021 = vrcp.f32 %v4616_v55 }
 0x2dd   : > { %v1477_v19 = vpop.f32.mrf.mxu3  ;;  %v4631_v48 = vadd.f32 %v1448_v2, %v4578_v43  ;;  %3023 = vpow2.f32 %v2714_v63 }
 0x2de   : > { %3025 = vrcp.f32 %v4626_v32  ;;  %v4663_v24 = vadd.f32 %v1477_v19, %v4578_v43  ;;  %v1588_v43 = vand.u32 2147483647, %v4608_v27 }
 0x2df   : > { %v3016_v12 = vpop.eup %3015  ;;  %3027 = vpow2.f32 %v2716_v4  ;;  %v2717_v45 = vmul.f32 -1.442695, %v4631_v48  ;;  %v4704_v4 = vadd.f32 %v4624_v49, %v1567_v29 }
 0x2e0   : > { %v4635_v40 = vpop.eup %3017  ;;  %v4643_v28 = vadd.f32 1.0, %v3016_v12  ;;  %3029 = vrcp.f32 %v4638_v14  ;;  %v2718_v63 = vmul.f32 -1.442695, %v4663_v24  ;;  %vm4715_vm11 = vcmp.eq.f32.partialorder %v1588_v43, 8.507059e+37 }
 0x2e1   : > { %v3020_v9 = vpop.eup %3019  ;;  %v1580_v57 = vmul.f32 %v4635_v40, %v4608_v27  ;;  %3031 = vpow2.f32 %v2717_v45  ;;  %v1618_v45 = vand.u32 2147483647, %v4616_v55  ;;  %vm1585_vm8 = vweird.f32 %v4635_v40 }
 0x2e2   : > { %v4641_v25 = vpop.eup %3021  ;;  %v4650_v10 = vadd.f32 1.0, %v3020_v9  ;;  %3033 = vrcp.f32 %v4643_v28  ;;  %vm4749_vm14 = vmor %vm1584_vm5, %vm1585_vm8  ;;  %vm1674_vm3 = vweird.f32 %v4643_v28 }
 0x2e3   : > { %v3024_v61 = vpop.eup %3023  ;;  %v1610_v21 = vmul.f32 %v4641_v25, %v4616_v55  ;;  %v1581_v46 = vsub.f32 1.0, %v1580_v57  ;;  %vm4736_vm7 = vcmp.eq.f32.partialorder %v1618_v45, 8.507059e+37  ;;  %vm1615_vm9 = vweird.f32 %v4641_v25 }
 0x2e4   : > { %v1451_v39 = vpop.f32.mrf.mxu2  ;;  %v4657_v11 = vpop.eup %3025  ;;  %3035 = vrcp.f32 %v4650_v10  ;;  %v4673_v6 = vadd.f32 1.0, %v3024_v61  ;;  %vm4767_vm0 = vmor %vm1614_vm2, %vm1615_vm9 }
 0x2e5   : > { %v1480_v62 = vpop.f32.mrf.mxu3  ;;  %v3028_v47 = vpop.eup %3027  ;;  %v4676_v3 = vadd.f32 %v1451_v39, %v4574_v56  ;;  %v1611_v20 = vsub.f32 1.0, %v1610_v21  ;;  %v1595_v18 = vmul.f32 %v4657_v11, %v4626_v32  ;;  %v1582_v12 = vmul.f32 %v4635_v40, %v1581_v46 }
 0x2e6   : > { %v4683_v22 = vpop.eup %3029  ;;  %v4693_v50 = vadd.f32 1.0, %v3028_v47  ;;  %v4697_v2 = vadd.f32 %v1480_v62, %v4574_v56  ;;  %3037 = vrcp.f32 %v4673_v6  ;;  %v1620_v39 = vand.u32 2147483648, %v4616_v55 }
 0x2e7   : > { %v3032_v19 = vpop.eup %3031  ;;  %v2719_v23 = vmul.f32 -1.442695, %v4676_v3  ;;  %v1612_v57 = vmul.f32 %v4641_v25, %v1611_v20  ;;  %3039 = vpow2.f32 %v2718_v63  ;;  %v1596_v7 = vsub.f32 1.0, %v1595_v18 }
 0x2e8   : > { %v4708_v9 = vpop.eup %3033  ;;  %v4712_v56 = vadd.f32 1.0, %v3032_v19  ;;  %v1640_v21 = vmul.f32 %v4683_v22, %v4638_v14  ;;  %3041 = vrcp.f32 %v4693_v50  ;;  %v2720_v62 = vmul.f32 -1.442695, %v4697_v2 }
 0x2e9   : > { %v1583_v47 = vadd.f32 %v4635_v40, %v1582_v12  ;;  %v1670_v29 = vmul.f32 %v4708_v9, %v4643_v28  ;;  %v1613_v18 = vadd.f32 %v4641_v25, %v1612_v57  ;;  %v1621_v63 = vor.u32 1.1754944e-38, %v1620_v39 }
 0x2ea   : > { %v4724_v61 = vpop.eup %3035  ;;  %3043 = vrcp.f32 %v4712_v56  ;;  %v1597_v45 = vmul.f32 %v4657_v11, %v1596_v7  ;;  %v1641_v37 = vsub.f32 1.0, %v1640_v21  ;;  %vm1645_vm12 = vweird.f32 %v4683_v22 }
 0x2eb   : > { %3045 = vpow2.f32 %v2719_v23  ;;  %v1625_v19 = vmul.f32 %v4724_v61, %v4650_v10  ;;  %v1587_v39 = vsel %vm4749_vm14, %v4635_v40, %v1583_v47  ;;  %v1671_v33 = vsub.f32 1.0, %v1670_v29  ;;  %vm4832_vm15 = vmor %vm1644_vm1, %vm1645_vm12 }
 0x2ec   : > { %v1453_v8 = vpop.f32.mrf.mxu2  ;;  %v4745_v12 = vpop.eup %3037  ;;  %3047 = vpow2.f32 %v2720_v62  ;;  %v1648_v62 = vand.u32 2147483647, %v4638_v14  ;;  %v1650_v40 = vand.u32 2147483648, %v4638_v14  ;;  %v1617_v29 = vsel %vm4767_vm0, %v4641_v25, %v1613_v18 }
 0x2ed   : > { %v4722_v42 = vadd.f32 %v1453_v8, %v4576_v34  ;;  %v1482_v20 = vpop.f32.mrf.mxu3  ;;  %v3040_v57 = vpop.eup %3039  ;;  %v1655_v55 = vmul.f32 %v4745_v12, %v4673_v6  ;;  %v4787_v52 = vsel %vm4715_vm11, %v4680_v60, %v1587_v39  ;;  %v1642_v23 = vmul.f32 %v4683_v22, %v1641_v37 }
 0x2ee   : > { %v4759_v41 = vadd.f32 %v1482_v20, %v4576_v34  ;;  %v4761_v27 = vpop.eup %3041  ;;  %v4774_v47 = vadd.f32 1.0, %v3040_v57  ;;  %v4790_v57 = vadd.f32 %v4657_v11, %v1597_v45  ;;  %v1672_v25 = vmul.f32 %v4708_v9, %v1671_v33 }
 0x2ef   : > { %v2721_v43 = vmul.f32 -1.442695, %v4722_v42  ;;  %v1685_v18 = vmul.f32 %v4761_v27, %v4693_v50  ;;  %v4802_v60 = vsel %vm4736_vm7, %v1621_v63, %v1617_v29  ;;  %vm4804_vm4 = vcmp.eq.f32.partialorder %v1648_v62, 8.507059e+37 }
 0x2f0   : > { %v4776_v34 = vpop.eup %3043  ;;  %v2722_v20 = vmul.f32 -1.442695, %v4759_v41  ;;  %v1651_v37 = vor.u32 1.1754944e-38, %v1650_v40  ;;  %v1656_v38 = vsub.f32 1.0, %v1655_v55  ;;  %v1643_v46 = vadd.f32 %v4683_v22, %v1642_v23 }
 0x2f1   : > { %3049 = vpow2.f32 %v2721_v43  ;;  %v1626_v43 = vsub.f32 1.0, %v1625_v19  ;;  %v3046_v8 = vpop.eup %3045  ;;  %v1700_v33 = vmul.f32 %v4776_v34, %v4712_v56  ;;  %v1673_v40 = vadd.f32 %v4708_v9, %v1672_v25 }
 0x2f2   : > { %3051 = vrcp.f32 %v4774_v47  ;;  %v4798_v19 = vadd.f32 1.0, %v3046_v8  ;;  %v3048_v7 = vpop.eup %3047  ;;  %v1678_v8 = vand.u32 2147483647, %v4643_v28  ;;  %vm1675_vm6 = vweird.f32 %v4708_v9 }
 0x2f3   : > { %3053 = vpow2.f32 %v2722_v20  ;;  %v1627_v39 = vmul.f32 %v4724_v61, %v1626_v43  ;;  %v4815_v63 = vadd.f32 1.0, %v3048_v7  ;;  %v1680_v29 = vand.u32 2147483648, %v4643_v28  ;;  %vm4847_vm5 = vmor %vm1674_vm3, %vm1675_vm6 }
 0x2f4   : > { %3055 = vrcp.f32 %v4798_v19  ;;  %v1686_v43 = vsub.f32 1.0, %v1685_v18  ;;  %v1701_v21 = vsub.f32 1.0, %v1700_v33  ;;  %v1657_v18 = vmul.f32 %v4745_v12, %v1656_v38 }
 0x2f5   : > { %3057 = vrcp.f32 %v4815_v63  ;;  %v4828_v7 = vadd.f32 %v4724_v61, %v1627_v39  ;;  %vm4838_vm10 = vcmp.eq.f32.partialorder %v1678_v8, 8.507059e+37  ;;  %v1647_v39 = vsel %vm4832_vm15, %v4683_v22, %v1643_v46 }
 0x2f6   : > { %v1708_v16 = vand.u32 2147483647, %v4712_v56  ;;  %v1710_v38 = vand.u32 2147483648, %v4712_v56  ;;  %v1677_v8 = vsel %vm4847_vm5, %v4708_v9, %v1673_v40  ;;  %v1681_v25 = vor.u32 1.1754944e-38, %v1680_v29 }
 0x2f7   : > { %v3050_v45 = vpop.eup %3049  ;;  %v1687_v22 = vmul.f32 %v4761_v27, %v1686_v43  ;;  %v1702_v20 = vmul.f32 %v4776_v34, %v1701_v21  ;;  %v4869_v58 = vsel %vm4804_vm4, %v1651_v37, %v1647_v39  ;;  %v4872_v9 = vadd.f32 %v4745_v12, %v1657_v18 }
 0x2f8   : > { %v4817_v62 = vadd.f32 1.0, %v3050_v45  ;;  %v4825_v23 = vpop.eup %3051  ;;  %vm1704_vm11 = vweird.f32 %v4712_v56  ;;  %v4881_v21 = vsel %vm4838_vm10, %v1681_v25, %v1677_v8  ;;  %vm4883_vm8 = vcmp.eq.f32.partialorder %v1708_v16, 8.507059e+37 }
 0x2f9   : > { %v3054_v33 = vpop.eup %3053  ;;  %v1715_v31 = vmul.f32 %v4825_v23, %v4774_v47  ;;  %v1711_v59 = vor.u32 1.1754944e-38, %v1710_v38  ;;  %v1738_v39 = vand.u32 2147483647, %v4798_v19  ;;  %v4889_v18 = vadd.f32 %v4761_v27, %v1687_v22 }
 0x2fa   : > { %3059 = vrcp.f32 %v4817_v62  ;;  %v4854_v28 = vpop.eup %3055  ;;  %v4875_v40 = vadd.f32 1.0, %v3054_v33  ;;  %v1740_v33 = vand.u32 2147483648, %v4798_v19  ;;  %v1703_v16 = vadd.f32 %v4776_v34, %v1702_v20 }
 0x2fb   : > { %v1730_v13 = vmul.f32 %v4854_v28, %v4798_v19  ;;  %v4877_v29 = vpop.eup %3057  ;;  %vm1705_vm2 = vweird.f32 %v4776_v34  ;;  %v1716_v8 = vsub.f32 1.0, %v1715_v31  ;;  %vm1690_vm7 = vweird.f32 %v4761_v27 }
 0x2fc   : > { %v1745_v14 = vmul.f32 %v4877_v29, %v4815_v63  ;;  %3061 = vrcp.f32 %v4875_v40  ;;  %vm1735_vm9 = vweird.f32 %v4854_v28  ;;  %vm1719_vm14 = vweird.f32 %v4774_v47  ;;  %vm4913_vm12 = vmor %vm1704_vm11, %vm1705_vm2 }
 0x2fd   : > { %v1731_v37 = vsub.f32 1.0, %v1730_v13  ;;  %v1725_v46 = vand.u32 2147483648, %v4774_v47  ;;  %vm1734_vm0 = vweird.f32 %v4798_v19  ;;  %vm4906_vm1 = vcmp.eq.f32.partialorder %v1738_v39, 8.507059e+37 }
 0x2fe   : > { %v1746_v25 = vsub.f32 1.0, %v1745_v14  ;;  %vm1689_vm4 = vweird.f32 %v4693_v50  ;;  %v1741_v14 = vor.u32 1.1754944e-38, %v1740_v33  ;;  %vm1749_vm6 = vweird.f32 %v4815_v63  ;;  %vm4927_vm10 = vmor %vm1734_vm0, %vm1735_vm9 }
 0x2ff   : > { %v1732_v13 = vmul.f32 %v4854_v28, %v1731_v37  ;;  %vm1660_vm15 = vweird.f32 %v4745_v12  ;;  %v1707_v19 = vsel %vm4913_vm12, %v4776_v34, %v1703_v16  ;;  %v1717_v39 = vmul.f32 %v4825_v23, %v1716_v8 }
 0x300   : > { %v3060_v45 = vpop.eup %3059  ;;  %v1747_v55 = vmul.f32 %v4877_v29, %v1746_v25  ;;  %vm1720_vm3 = vweird.f32 %v4825_v23  ;;  %v1770_v33 = vand.u32 2147483648, %v4817_v62  ;;  %v1768_v34 = vand.u32 2147483647, %v4817_v62 }
 0x301   : > { %v1760_v22 = vmul.f32 %v3060_v45, %v4817_v62  ;;  %v1733_v20 = vadd.f32 %v4854_v28, %v1732_v13  ;;  %vm1765_vm5 = vweird.f32 %v3060_v45  ;;  %vm1750_vm9 = vweird.f32 %v4877_v29 }
 0x302   : > { %v3062_v25 = vpop.eup %3061  ;;  %v1748_v16 = vadd.f32 %v4877_v29, %v1747_v55  ;;  %v1753_v8 = vand.u32 2147483647, %v4815_v63  ;;  %v1712_v56 = vsel %vm4883_vm8, %v1711_v59, %v1707_v19  ;;  %vm1764_vm0 = vweird.f32 %v4817_v62  ;;  %vm4954_vm8 = vmor %vm1749_vm6, %vm1750_vm9 }
 0x303   : > { %v1761_v13 = vsub.f32 1.0, %v1760_v22  ;;  %v1737_v22 = vsel %vm4927_vm10, %v4854_v28, %v1733_v20  ;;  %v1775_v37 = vmul.f32 %v3062_v25, %v4875_v40  ;;  %v1755_v28 = vand.u32 2147483648, %v4815_v63  ;;  %vm1766_vm11 = vmor %vm1764_vm0, %vm1765_vm5 }
 0x304   : > { %vm1629_vm10 = vweird.f32 %v4650_v10  ;;  %v1718_v55 = vadd.f32 %v4825_v23, %v1717_v39  ;;  %v1771_v35 = vor.u32 1.1754944e-38, %v1770_v33  ;;  %vm1769_vm2 = vcmp.eq.f32.partialorder %v1768_v34, 8.507059e+37  ;;  %vm4969_vm5 = vmor %vm1719_vm14, %vm1720_vm3 }
 0x305   : > { %v1762_v38 = vmul.f32 %v3060_v45, %v1761_v13  ;;  %v1742_v13 = vsel %vm4906_vm1, %v1741_v14, %v1737_v22  ;;  %v1776_v30 = vsub.f32 1.0, %v1775_v37  ;;  %v1783_v59 = vand.u32 2147483647, %v4875_v40 }
 0x306   : > { %vm1570_vm12 = vweird.f32 %v4624_v49  ;;  %vm1599_vm1 = vweird.f32 %v4626_v32  ;;  %v1752_v31 = vsel %vm4954_vm8, %v4877_v29, %v1748_v16  ;;  %vm1780_vm6 = vweird.f32 %v3062_v25 }
 0x307   : > { %v1763_v20 = vadd.f32 %v3060_v45, %v1762_v38  ;;  %v1785_v38 = vand.u32 2147483648, %v4875_v40  ;;  %v1777_v63 = vmul.f32 %v3062_v25, %v1776_v30  ;;  %v1726_v19 = vor.u32 1.1754944e-38, %v1725_v46 }
 0x308   : > { %v1801_v39 = vmul.f32 %v1742_v13, %v4676_v3  ;;  %v1756_v33 = vor.u32 1.1754944e-38, %v1755_v28  ;;  %v1722_v30 = vsel %vm4969_vm5, %v4825_v23, %v1718_v55  ;;  %vm1754_vm14 = vcmp.eq.f32.partialorder %v1753_v8, 8.507059e+37 }
 0x309   : > { %v1767_v62 = vsel %vm1766_vm11, %v3060_v45, %v1763_v20  ;;  %vm1569_vm11 = vweird.f32 %v4600_v5  ;;  %v1778_v46 = vadd.f32 %v3062_v25, %v1777_v63  ;;  %vm1779_vm3 = vweird.f32 %v4875_v40  ;;  %v6061_v63 = vld [vmem:[#allocation8_spill] sm:$0xff] }
 0x30a   : > { %v1772_v14 = vsel %vm1769_vm2, %v1771_v35, %v1767_v62  ;;  %vm4980_vm2 = vmor %vm1689_vm4, %vm1690_vm7  ;;  %v1799_v3 = vmul.f32 %v1712_v56, %v4631_v48  ;;  %v1786_v29 = vor.u32 1.1754944e-38, %v1785_v38  ;;  %v6038_v37 = vand.u32 2147483647, %v4774_v47 }
 0x30b   : > { %v1803_v22 = vmul.f32 %v1772_v14, %v4722_v42  ;;  %v1757_v42 = vsel %vm1754_vm14, %v1756_v33, %v1752_v31  ;;  %vm1781_vm9 = vmor %vm1779_vm3, %vm1780_vm6  ;;  %v1692_v16 = vsel %vm4980_vm2, %v4761_v27, %v4889_v18  ;;  %vm1784_vm4 = vcmp.eq.f32.partialorder %v1783_v59, 8.507059e+37  ;;  %v6064_v33 = vld [vmem:[#allocation24_spill] sm:$0xff] }
 0x30c   : > { %vm1724_vm7 = vcmp.eq.f32.partialorder %v6038_v37, 8.507059e+37  ;;  %v1782_v28 = vsel %vm1781_vm9, %v3062_v25, %v1778_v46  ;;  %vm6039_vm0 = vweird.f32 %v4673_v6  ;;  %v1797_v23 = vmul.f32 %v4881_v21, %v4605_v1  ;;  %vm5065_vm9 = vmor %vm1569_vm11, %vm1570_vm12  ;;  %v2851_v46 = vld [vmem:[%s5704_s3 + $0x40] sm:$0xff]  ;;  %v5108_v37 = vpop.permute.xlu0 %1863  ;;  %v1854_v1 = vpop.permute.xlu2 %1853 }
 0x30d   : > { %v1820_v34 = vpack.c.bf16 %v1803_v22, %v1801_v39  ;;  %vm4999_vm8 = vmor %vm6039_vm0, %vm1660_vm15  ;;  %v6042_v40 = vand.u32 2147483648, %v4693_v50  ;;  %v1727_v27 = vsel %vm1724_vm7, %v1726_v19, %v1722_v30  ;;  %v1787_v18 = vsel %vm1784_vm4, %v1786_v29, %v1782_v28  ;;  %v5110_v28 = vpop.permute.xlu1 %1868 }
 0x30e   : > { %v1662_v47 = vsel %vm4999_vm8, %v4745_v12, %v4872_v9  ;;  %v6043_v25 = vand.u32 2147483647, %v4693_v50  ;;  %v1802_v56 = vmul.f32 %v1757_v42, %v4697_v2  ;;  %v1804_v20 = vmul.f32 %v1787_v18, %v4759_v41 }
 0x30f   : > { %v1696_v8 = vor.u32 1.1754944e-38, %v6042_v40  ;;  %1907 = vmatpush.bf16.msrb.mxu0 %v1820_v34  ;;  %vm6044_vm6 = vweird.f32 %v4724_v61  ;;  %v1795_v21 = vmul.f32 %v4869_v58, %v4597_v15  ;;  %v6047_v12 = vand.u32 2147483648, %v4673_v6  ;;  %v2853_v34 = vld [vmem:[%s5704_s3 + $0x50] sm:$0xff] }
 0x310   : > { %vm1694_vm15 = vcmp.eq.f32.partialorder %v6043_v25, 8.507059e+37  ;;  %vm5019_vm5 = vmor %vm1629_vm10, %vm6044_vm6  ;;  %v1818_v55 = vpack.c.bf16 %v1799_v3, %v1797_v23  ;;  %v6048_v2 = vand.u32 2147483647, %v4673_v6  ;;  %v1800_v13 = vmul.f32 %v1727_v27, %v4663_v24  ;;  %v6066_v3 = vld [vmem:[#allocation14_spill] sm:$0xff] }
 0x311   : > { %v1666_v9 = vor.u32 1.1754944e-38, %v6047_v12  ;;  %v1697_v50 = vsel %vm1694_vm15, %v1696_v8, %v1692_v16  ;;  %v1632_v41 = vsel %vm5019_vm5, %v4724_v61, %v4828_v7  ;;  %v1821_v43 = vpack.c.bf16 %v1804_v20, %v1802_v56  ;;  %v2854_v16 = vld [vmem:[%s5704_s3 + $0x58] sm:$0xff] }
 0x312   : > { %vm1664_vm2 = vcmp.eq.f32.partialorder %v6048_v2, 8.507059e+37  ;;  %v6049_v62 = vand.u32 2147483647, %v4594_v44  ;;  %vm6050_vm14 = vweird.f32 %v4657_v11  ;;  %v1793_v58 = vmul.f32 %v4802_v60, %v4588_v17  ;;  %v6060_v60 = vld [vmem:[#allocation7_spill] sm:$0xff] }
 0x313   : > { %vm5040_vm3 = vmor %vm1599_vm1, %vm6050_vm14  ;;  %v6053_v6 = vand.u32 2147483648, %v4650_v10  ;;  %v1667_v7 = vsel %vm1664_vm2, %v1666_v9, %v1662_v47  ;;  %1908 = vmatpush.bf16.msrb.mxu0 %v1818_v55  ;;  %v6054_v44 = vsel %vm4687_vm13, %v4614_v0, %v4666_v26  ;;  %v6055_v38 = vand.u32 2147483647, %v4650_v10  ;;  %1936 = vmatpush.bf16.msrb.mxu1 %v1821_v43 }
 0x314   : > { %vm1559_vm10 = vcmp.eq.f32.partialorder %v6049_v62, 8.507059e+37  ;;  %v1602_v59 = vsel %vm5040_vm3, %v4657_v11, %v4790_v57  ;;  %v1798_v17 = vmul.f32 %v1697_v50, %v4619_v53  ;;  %v1791_v0 = vmul.f32 %v4787_v52, %v4586_v36  ;;  %v5112_v48 = vpop.permute.xlu0 %1858  ;;  %v1849_v62 = vpop.permute.xlu2 %1848 }
 0x315   : > { %v1636_v61 = vor.u32 1.1754944e-38, %v6053_v6  ;;  %v1562_v24 = vsel %vm1559_vm10, %v4670_v54, %v6054_v44  ;;  %vm1634_vm1 = vcmp.eq.f32.partialorder %v6055_v38, 8.507059e+37  ;;  %v6058_v26 = vand.u32 2147483648, %v4626_v32  ;;  %v1844_v8 = vpop.permute.xlu1 %1843 }
 0x316   : > { %v1816_v10 = vpack.c.bf16 %v1795_v21, %v1793_v58  ;;  %v1572_v53 = vsel %vm5065_vm9, %v4624_v49, %v4704_v4  ;;  %v6059_v57 = vand.u32 2147483647, %v4626_v32  ;;  %v1796_v31 = vmul.f32 %v1667_v7, %v6060_v60  ;;  %v6065_v32 = vld [vmem:[#allocation23_spill] sm:$0xff] }
 0x317   : > { %v1606_v11 = vor.u32 1.1754944e-38, %v6058_v26  ;;  %v1637_v54 = vsel %vm1634_vm1, %v1636_v61, %v1632_v41  ;;  %v1819_v14 = vpack.c.bf16 %v1800_v13, %v1798_v17  ;;  %v1789_v45 = vmul.f32 %v1562_v24, %v6061_v63 }
 0x318   : > { %vm1604_vm13 = vcmp.eq.f32.partialorder %v6059_v57, 8.507059e+37  ;;  %v6062_v36 = vand.u32 2147483648, %v4600_v5  ;;  %1909 = vmatpush.bf16.msrb.mxu0 %v1816_v10  ;;  %v6063_v39 = vand.u32 2147483647, %v4600_v5  ;;  %v1794_v22 = vmul.f32 %v1637_v54, %v6064_v33  ;;  %v2852_v5 = vld [vmem:[%s5704_s3 + $0x48] sm:$0xff] }
 0x319   : > { %v1607_v19 = vsel %vm1604_vm13, %v1606_v11, %v1602_v59  ;;  %1937 = vmatpush.bf16.msrb.mxu1 %v1819_v14  ;;  %v1814_v4 = vpack.c.bf16 %v1791_v0, %v1789_v45  ;;  %vm6067_vm11 = vcmask 523264  }
 0x31a   : > { %v1576_v52 = vor.u32 1.1754944e-38, %v6062_v36  ;;  %vm1574_vm12 = vcmp.eq.f32.partialorder %v6063_v39, 8.507059e+37  ;;  %v1792_v35 = vmul.f32 %v1607_v19, %v6065_v32  ;;  %v1817_v30 = vpack.c.bf16 %v1796_v31, %v1794_v22  ;;  %vm6068_vm7 = vmmov %vm6067_vm11 }
 0x31b   : > { %vm6069_vm4 = vmmov %vm6068_vm7 }
 0x31c   : > { %v1577_v49 = vsel %vm1574_vm12, %v1576_v52, %v1572_v53  ;;  %1910 = vmatpush.bf16.msrb.mxu0 %v1814_v4  ;;  %vm6070_vm0 = vmmov %vm6069_vm4  ;;  %v1834_v18 = vpop.permute.xlu0 %1833 }
 0x31d   : > { %v1790_v42 = vmul.f32 %v1577_v49, %v6066_v3  ;;  %1938 = vmatpush.bf16.msrb.mxu1 %v1817_v30  ;;  %vm6071_vm8 = vmmov %vm6070_vm0  ;;  %v1839_v21 = vpop.permute.xlu1 %1838 }
 0x31e   : > { %vm6072_vm15 = vmmov %vm6070_vm0 }
 0x31f   : > { %v1815_v29 = vpack.c.bf16 %v1792_v35, %v1790_v42  ;;  %2755 = vmatmul.msk.bf16.vlgmr.msrb.gmra.mxu0 %vm6067_vm11, %v2851_v46  ;;  %vm6073_vm6 = vmmov %vm6070_vm0 }
 0x320   : > { %vm6074_vm5 = vmmov %vm6070_vm0 }
 0x321   : > { %1939 = vmatpush.bf16.msrb.mxu1 %v1815_v29 }
 0x324   : > { %2759 = vmatmul.msk.bf16.vlgmr.msrb.gmra.mxu1 %vm6068_vm7, %v2851_v46 }
 0x32f   : > { %2756 = vmatmul.msk.bf16.gmra.mxu0 %vm6069_vm4, %v2852_v5 }
 0x334   : > { %2760 = vmatmul.msk.bf16.gmra.mxu1 %vm6070_vm0, %v2852_v5 }
 0x33f   : > { %2757 = vmatmul.msk.bf16.gmra.mxu0 %vm6071_vm8, %v2853_v34 }
 0x344   : > { %2761 = vmatmul.msk.bf16.gmra.mxu1 %vm6072_vm15, %v2853_v34 }
 0x34f   : > { %2758 = vmatmul.msk.bf16.gmra.mxu0 %vm6073_vm6, %v2854_v16 }
 0x354   : > { %2762 = vmatmul.msk.bf16.gmra.mxu1 %vm6074_vm5, %v2854_v16 }
 0x39c   : > { %v1912_v23 = vpop.f32.mrf.mxu0 }
 0x39d   : > { %v5114_v47 = vadd.f32 %v1912_v23, %v1834_v18 }
 0x39f   : > { %6075 = vst [vmem:[#allocation22_spill] sm:$0xff] %v5114_v47  ;;  %v2763_v56 = vmul.f32 -1.442695, %v5114_v47 }
 0x3a1   : > { %v1941_v40 = vpop.f32.mrf.mxu1  ;;  %3063 = vpow2.f32 %v2763_v56 }
 0x3a2   : > { %v5119_v9 = vadd.f32 %v1941_v40, %v1834_v18 }
 0x3a4   : > { %v1914_v27 = vpop.f32.mrf.mxu0  ;;  %6077 = vst [vmem:[#allocation4_spill] sm:$0xff] %v5119_v9  ;;  %v2764_v2 = vmul.f32 -1.442695, %v5119_v9 }
 0x3a5   : > { %v5117_v12 = vadd.f32 %v1914_v27, %v1839_v21 }
 0x3a7   : > { %6076 = vst [vmem:[#allocation21_spill] sm:$0xff] %v5117_v12  ;;  %v2765_v55 = vmul.f32 -1.442695, %v5117_v12  ;;  %v3064_v43 = vpop.eup %3063 }
 0x3a8   : > { %v5128_v6 = vadd.f32 1.0, %v3064_v43 }
 0x3a9   : > { %v1943_v25 = vpop.f32.mrf.mxu1  ;;  %3065 = vpow2.f32 %v2765_v55 }
 0x3aa   : > { %v5125_v15 = vadd.f32 %v1943_v25, %v1839_v21  ;;  %3067 = vpow2.f32 %v2764_v2  ;;  %v2036_v34 = vand.u32 2147483648, %v5128_v6  ;;  %vm2030_vm2 = vweird.f32 %v5128_v6 }
 0x3ac   : > { %v1917_v20 = vpop.f32.mrf.mxu0  ;;  %6078 = vst [vmem:[#allocation18_spill] sm:$0xff] %v5125_v15  ;;  %v2766_v44 = vmul.f32 -1.442695, %v5125_v15 }
 0x3ad   : > { %v5122_v41 = vadd.f32 %v1917_v20, %v1844_v8 }
 0x3af   : > { %v2767_v58 = vmul.f32 -1.442695, %v5122_v41  ;;  %v3066_v24 = vpop.eup %3065 }
 0x3b0   : > { %v3068_v51 = vpop.eup %3067  ;;  %v5137_v0 = vadd.f32 1.0, %v3066_v24 }
 0x3b1   : > { %v1946_v50 = vpop.f32.mrf.mxu1  ;;  %3069 = vpow2.f32 %v2767_v58  ;;  %v5142_v10 = vadd.f32 1.0, %v3068_v51 }
 0x3b2   : > { %3071 = vrcp.f32 %v5128_v6  ;;  %v5134_v59 = vadd.f32 %v1946_v50, %v1844_v8  ;;  %v2066_v50 = vand.u32 2147483648, %v5137_v0  ;;  %vm2060_vm3 = vweird.f32 %v5137_v0 }
 0x3b3   : > { %3073 = vpow2.f32 %v2766_v44 }
 0x3b4   : > { %v1919_v13 = vpop.f32.mrf.mxu0  ;;  %6079 = vst [vmem:[#allocation2_spill] sm:$0xff] %v5134_v59  ;;  %v2768_v11 = vmul.f32 -1.442695, %v5134_v59 }
 0x3b5   : > { %v5130_v61 = vadd.f32 %v1919_v13, %v1849_v62 }
 0x3b7   : > { %v2769_v38 = vmul.f32 -1.442695, %v5130_v61  ;;  %v3070_v54 = vpop.eup %3069 }
 0x3b8   : > { %v5146_v60 = vpop.eup %3071  ;;  %v5150_v14 = vadd.f32 1.0, %v3070_v54 }
 0x3b9   : > { %v1948_v7 = vpop.f32.mrf.mxu1  ;;  %3075 = vpow2.f32 %v2769_v38  ;;  %v3074_v45 = vpop.eup %3073  ;;  %v2026_v36 = vmul.f32 %v5146_v60, %v5128_v6  ;;  %vm2031_vm10 = vweird.f32 %v5146_v60 }
 0x3ba   : > { %v5144_v53 = vadd.f32 %v1948_v7, %v1849_v62  ;;  %3077 = vrcp.f32 %v5137_v0  ;;  %v5161_v22 = vadd.f32 1.0, %v3074_v45  ;;  %vm5222_vm14 = vmor %vm2030_vm2, %vm2031_vm10  ;;  %vm2090_vm13 = vweird.f32 %v5150_v14 }
 0x3bb   : > { %3079 = vpow2.f32 %v2768_v11  ;;  %v2027_v4 = vsub.f32 1.0, %v2026_v36 }
 0x3bc   : > { %v1922_v17 = vpop.f32.mrf.mxu0  ;;  %6080 = vst [vmem:[#allocation26_spill] sm:$0xff] %v5144_v53  ;;  %3081 = vrcp.f32 %v5142_v10  ;;  %v2770_v52 = vmul.f32 -1.442695, %v5144_v53 }
 0x3bd   : > { %v5139_v26 = vadd.f32 %v1922_v17, %v1854_v1  ;;  %v2028_v40 = vmul.f32 %v5146_v60, %v2027_v4 }
 0x3bf   : > { %v2771_v31 = vmul.f32 -1.442695, %v5139_v26  ;;  %v3076_v19 = vpop.eup %3075  ;;  %v5199_v2 = vadd.f32 %v5146_v60, %v2028_v40 }
 0x3c0   : > { %v5164_v49 = vpop.eup %3077  ;;  %v5166_v32 = vadd.f32 1.0, %v3076_v19 }
 0x3c1   : > { %v1951_v57 = vpop.f32.mrf.mxu1  ;;  %3083 = vpow2.f32 %v2771_v31  ;;  %v3080_v30 = vpop.eup %3079  ;;  %v2056_v16 = vmul.f32 %v5164_v49, %v5137_v0  ;;  %vm2061_vm1 = vweird.f32 %v5164_v49 }
 0x3c2   : > { %v5156_v39 = vadd.f32 %v1951_v57, %v1854_v1  ;;  %3085 = vrcp.f32 %v5150_v14  ;;  %v5169_v3 = vpop.eup %3081  ;;  %v5180_v8 = vadd.f32 1.0, %v3080_v30  ;;  %v5192_v1 = vor.u32 1.1754944e-38, %v2036_v34  ;;  %vm5272_vm9 = vmor %vm2060_vm3, %vm2061_vm1 }
 0x3c3   : > { %3087 = vpow2.f32 %v2770_v52  ;;  %v2057_v21 = vsub.f32 1.0, %v2056_v16  ;;  %vm2120_vm4 = vweird.f32 %v5166_v32 }
 0x3c4   : > { %v1924_v63 = vpop.f32.mrf.mxu0  ;;  %6081 = vst [vmem:[#allocation6_spill] sm:$0xff] %v5156_v39  ;;  %v2772_v46 = vmul.f32 -1.442695, %v5156_v39  ;;  %3089 = vrcp.f32 %v5161_v22 }
 0x3c5   : > { %v5159_v33 = vadd.f32 %v1924_v63, %v5112_v48  ;;  %3091 = vrcp.f32 %v5166_v32  ;;  %v2058_v57 = vmul.f32 %v5164_v49, %v2057_v21  ;;  %v5229_v63 = vor.u32 1.1754944e-38, %v2066_v50 }
 0x3c6   : > { %3093 = vpow2.f32 %v2772_v46 }
 0x3c7   : > { %v2773_v42 = vmul.f32 -1.442695, %v5159_v33  ;;  %v3084_v5 = vpop.eup %3083 }
 0x3c8   : > { %v5183_v27 = vpop.eup %3085  ;;  %v5189_v56 = vadd.f32 1.0, %v3084_v5 }
 0x3c9   : > { %v1953_v35 = vpop.f32.mrf.mxu1  ;;  %v3088_v18 = vpop.eup %3087  ;;  %3095 = vpow2.f32 %v2773_v42  ;;  %v2086_v13 = vmul.f32 %v5183_v27, %v5150_v14  ;;  %v2094_v42 = vand.u32 2147483647, %v5150_v14  ;;  %vm2091_vm11 = vweird.f32 %v5183_v27 }
 0x3ca   : > { %v5173_v29 = vadd.f32 %v1953_v35, %v5112_v48  ;;  %v2041_v48 = vmul.f32 %v5169_v3, %v5142_v10  ;;  %3097 = vrcp.f32 %v5180_v8  ;;  %v5205_v62 = vpop.eup %3089  ;;  %v5208_v44 = vadd.f32 1.0, %v3088_v18  ;;  %vm5311_vm7 = vmor %vm2090_vm13, %vm2091_vm11 }
 0x3cb   : > { %3099 = vrcp.f32 %v5189_v56  ;;  %v5211_v24 = vpop.eup %3091  ;;  %v2071_v52 = vmul.f32 %v5205_v62, %v5161_v22  ;;  %v2087_v19 = vsub.f32 1.0, %v2086_v13  ;;  %v2096_v13 = vand.u32 2147483648, %v5150_v14 }
 0x3cc   : > { %v1927_v23 = vpop.f32.mrf.mxu0  ;;  %v2774_v20 = vmul.f32 -1.442695, %v5173_v29  ;;  %v2042_v58 = vsub.f32 1.0, %v2041_v48  ;;  %v3094_v11 = vpop.eup %3093  ;;  %v2116_v35 = vmul.f32 %v5211_v24, %v5166_v32  ;;  %vm5277_vm12 = vcmp.eq.f32.partialorder %v2094_v42, 8.507059e+37 }
 0x3cd   : > { %v5196_v55 = vadd.f32 %v1927_v23, %v5108_v37  ;;  %v5254_v23 = vadd.f32 %v5164_v49, %v2058_v57  ;;  %v5258_v18 = vadd.f32 1.0, %v3094_v11  ;;  %v2072_v21 = vsub.f32 1.0, %v2071_v52  ;;  %v6148_v11 = vld [vmem:[#allocation6_spill] sm:$0xff] }
 0x3ce   : > { %3101 = vpow2.f32 %v2774_v20  ;;  %v2043_v4 = vmul.f32 %v5169_v3, %v2042_v58  ;;  %v2088_v50 = vmul.f32 %v5183_v27, %v2087_v19  ;;  %v2117_v57 = vsub.f32 1.0, %v2116_v35 }
 0x3cf   : > { %v2775_v17 = vmul.f32 -1.442695, %v5196_v55  ;;  %3103 = vrcp.f32 %v5208_v44  ;;  %v2073_v7 = vmul.f32 %v5205_v62, %v2072_v21  ;;  %vm2121_vm0 = vweird.f32 %v5211_v24 }
 0x3d0   : > { %v5264_v58 = vadd.f32 %v5169_v3, %v2043_v4  ;;  %v2118_v4 = vmul.f32 %v5211_v24, %v2117_v57  ;;  %v2126_v57 = vand.u32 2147483648, %v5166_v32  ;;  %vm5359_vm15 = vmor %vm2120_vm4, %vm2121_vm0  ;;  %vm2150_vm6 = vweird.f32 %v5189_v56 }
 0x3d1   : > { %v1956_v43 = vpop.f32.mrf.mxu1  ;;  %3105 = vpow2.f32 %v2775_v17  ;;  %vm2165_vm0 = vweird.f32 %v5258_v18 }
 0x3d2   : > { %v5216_v51 = vadd.f32 %v1956_v43, %v5108_v37  ;;  %v3096_v37 = vpop.eup %3095  ;;  %6084 = vst [vmem:[#allocation25_spill] sm:$0xff] %v5264_v58  ;;  %v2119_v25 = vadd.f32 %v5211_v24, %v2118_v4  ;;  %v2156_v4 = vand.u32 2147483648, %v5189_v56 }
 0x3d3   : > { %v5242_v30 = vadd.f32 1.0, %v3096_v37  ;;  %v5244_v46 = vpop.eup %3097 }
 0x3d4   : > { %v1929_v45 = vpop.f32.mrf.mxu0  ;;  %v2776_v5 = vmul.f32 -1.442695, %v5216_v51  ;;  %v5251_v16 = vpop.eup %3099  ;;  %v2101_v17 = vmul.f32 %v5244_v46, %v5180_v8 }
 0x3d5   : > { %v5249_v34 = vadd.f32 %v1929_v45, %v5110_v28  ;;  %v3102_v20 = vpop.eup %3101  ;;  %3107 = vrcp.f32 %v5242_v30  ;;  %v2146_v35 = vmul.f32 %v5251_v16, %v5189_v56  ;;  %vm2151_vm5 = vweird.f32 %v5251_v16 }
 0x3d6   : > { %3109 = vpow2.f32 %v2776_v5  ;;  %v5285_v19 = vpop.eup %3103  ;;  %v5294_v42 = vadd.f32 1.0, %v3102_v20  ;;  %v2102_v38 = vsub.f32 1.0, %v2101_v17  ;;  %v2124_v17 = vand.u32 2147483647, %v5166_v32  ;;  %vm5401_vm10 = vmor %vm2150_vm6, %vm2151_vm5 }
 0x3d7   : > { %v2777_v37 = vmul.f32 -1.442695, %v5249_v34  ;;  %3111 = vrcp.f32 %v5258_v18  ;;  %v3106_v5 = vpop.eup %3105  ;;  %v2131_v20 = vmul.f32 %v5285_v19, %v5208_v44  ;;  %v2147_v48 = vsub.f32 1.0, %v2146_v35 }
 0x3d8   : > { %v5306_v31 = vadd.f32 1.0, %v3106_v5  ;;  %v5319_v5 = vadd.f32 %v5205_v62, %v2073_v7  ;;  %v2103_v40 = vmul.f32 %v5244_v46, %v2102_v38  ;;  %v2154_v35 = vand.u32 2147483647, %v5189_v56 }
 0x3d9   : > { %v1958_v43 = vpop.f32.mrf.mxu1  ;;  %3113 = vpow2.f32 %v2777_v37  ;;  %v2132_v9 = vsub.f32 1.0, %v2131_v20  ;;  %vm5340_vm8 = vcmp.eq.f32.partialorder %v2124_v17, 8.507059e+37  ;;  %v2127_v38 = vor.u32 1.1754944e-38, %v2126_v57 }
 0x3da   : > { %v5283_v52 = vadd.f32 %v1958_v43, %v5110_v28  ;;  %v2089_v28 = vadd.f32 %v5183_v27, %v2088_v50  ;;  %v2097_v43 = vor.u32 1.1754944e-38, %v2096_v13  ;;  %3115 = vrcp.f32 %v5294_v42 }
 0x3db   : > { %v5302_v36 = vpop.eup %3107  ;;  %3117 = vrcp.f32 %v5306_v31  ;;  %v2148_v15 = vmul.f32 %v5251_v16, %v2147_v48  ;;  %v2133_v57 = vmul.f32 %v5285_v19, %v2132_v9  ;;  %vm5372_vm2 = vcmp.eq.f32.partialorder %v2154_v35, 8.507059e+37 }
 0x3dc   : > { %v2778_v21 = vmul.f32 -1.442695, %v5283_v52  ;;  %v3110_v50 = vpop.eup %3109  ;;  %v2093_v37 = vsel %vm5311_vm7, %v5183_v27, %v2089_v28  ;;  %v2176_v7 = vmul.f32 %v5302_v36, %v5242_v30  ;;  %v2186_v47 = vand.u32 2147483648, %v5242_v30 }
 0x3dd   : > { %v5326_v14 = vpop.eup %3111  ;;  %v5334_v13 = vadd.f32 1.0, %v3110_v50  ;;  %v5338_v27 = vsel %vm5277_vm12, %v2097_v43, %v2093_v37  ;;  %v5353_v43 = vadd.f32 %v5244_v46, %v2103_v40  ;;  %v2123_v40 = vsel %vm5359_vm15, %v5211_v24, %v2119_v25 }
 0x3de   : > { %3119 = vpow2.f32 %v2778_v21  ;;  %v2161_v20 = vmul.f32 %v5326_v14, %v5258_v18  ;;  %v2177_v50 = vsub.f32 1.0, %v2176_v7  ;;  %v2149_v21 = vadd.f32 %v5251_v16, %v2148_v15 }
 0x3df   : > { %v3114_v59 = vpop.eup %3113  ;;  %3121 = vrcp.f32 %v5334_v13  ;;  %v2184_v7 = vand.u32 2147483647, %v5242_v30  ;;  %v2157_v24 = vor.u32 1.1754944e-38, %v2156_v4  ;;  %v5395_v39 = vadd.f32 %v5285_v19, %v2133_v57 }
 0x3e0   : > { %v5350_v45 = vpop.eup %3115  ;;  %v5376_v37 = vadd.f32 1.0, %v3114_v59  ;;  %v2162_v9 = vsub.f32 1.0, %v2161_v20  ;;  %v5388_v59 = vsel %vm5340_vm8, %v2127_v38, %v2123_v40  ;;  %v2178_v53 = vmul.f32 %v5302_v36, %v2177_v50 }
 0x3e1   : > { %v5365_v17 = vpop.eup %3117  ;;  %v2191_v35 = vmul.f32 %v5350_v45, %v5294_v42  ;;  %vm2180_vm3 = vweird.f32 %v5242_v30  ;;  %v2153_v20 = vsel %vm5401_vm10, %v5251_v16, %v2149_v21  ;;  %vm5412_vm1 = vcmp.eq.f32.partialorder %v2184_v7, 8.507059e+37 }
 0x3e2   : > { %v2206_v48 = vmul.f32 %v5365_v17, %v5306_v31  ;;  %3123 = vrcp.f32 %v5376_v37  ;;  %v2187_v40 = vor.u32 1.1754944e-38, %v2186_v47  ;;  %v2179_v4 = vadd.f32 %v5302_v36, %v2178_v53 }
 0x3e3   : > { %v2192_v28 = vsub.f32 1.0, %v2191_v35  ;;  %vm2181_vm13 = vweird.f32 %v5302_v36  ;;  %v2216_v16 = vand.u32 2147483648, %v5306_v31  ;;  %vm2166_vm12 = vweird.f32 %v5326_v14 }
 0x3e4   : > { %v3120_v25 = vpop.eup %3119  ;;  %v2207_v12 = vsub.f32 1.0, %v2206_v48  ;;  %v2163_v48 = vmul.f32 %v5326_v14, %v2162_v9  ;;  %vm2195_vm11 = vweird.f32 %v5294_v42  ;;  %vm2211_vm7 = vweird.f32 %v5365_v17  ;;  %vm5449_vm8 = vmor %vm2180_vm3, %vm2181_vm13 }
 0x3e5   : > { %v5392_v58 = vpop.eup %3121  ;;  %v5407_v38 = vadd.f32 1.0, %v3120_v25  ;;  %v2214_v25 = vand.u32 2147483647, %v5306_v31  ;;  %v5435_v53 = vsel %vm5372_vm2, %v2157_v24, %v2153_v20  ;;  %vm2210_vm4 = vweird.f32 %v5306_v31 }
 0x3e6   : > { %v2208_v56 = vmul.f32 %v5365_v17, %v2207_v12  ;;  %v2221_v57 = vmul.f32 %v5392_v58, %v5334_v13  ;;  %v2199_v12 = vand.u32 2147483647, %v5294_v42  ;;  %v5442_v15 = vadd.f32 %v5326_v14, %v2163_v48  ;;  %vm5463_vm2 = vmor %vm2210_vm4, %vm2211_vm7 }
 0x3e7   : > { %3125 = vrcp.f32 %v5407_v38  ;;  %v2193_v31 = vmul.f32 %v5350_v45, %v2192_v28  ;;  %vm2196_vm15 = vweird.f32 %v5350_v45  ;;  %vm5455_vm6 = vcmp.eq.f32.partialorder %v2214_v25, 8.507059e+37 }
 0x3e8   : > { %v2222_v21 = vsub.f32 1.0, %v2221_v57  ;;  %v5425_v47 = vpop.eup %3123  ;;  %v2209_v9 = vadd.f32 %v5365_v17, %v2208_v56  ;;  %v2183_v20 = vsel %vm5449_vm8, %v5302_v36, %v2179_v4  ;;  %v2217_v56 = vor.u32 1.1754944e-38, %v2216_v16 }
 0x3e9   : > { %v2236_v57 = vmul.f32 %v5425_v47, %v5376_v37  ;;  %v2244_v28 = vand.u32 2147483647, %v5376_v37  ;;  %vm2225_vm3 = vweird.f32 %v5334_v13  ;;  %vm2226_vm13 = vweird.f32 %v5392_v58 }
 0x3ea   : > { %v2223_v35 = vmul.f32 %v5392_v58, %v2222_v21  ;;  %v2213_v25 = vsel %vm5463_vm2, %v5365_v17, %v2209_v9  ;;  %v2246_v36 = vand.u32 2147483648, %v5376_v37  ;;  %vm5476_vm4 = vcmp.eq.f32.partialorder %v2199_v12, 8.507059e+37  ;;  %vm5493_vm7 = vmor %vm2225_vm3, %vm2226_vm13 }
 0x3eb   : > { %v2237_v48 = vsub.f32 1.0, %v2236_v57  ;;  %vm2241_vm8 = vweird.f32 %v5425_v47  ;;  %v2188_v9 = vsel %vm5412_vm1, %v2187_v40, %v2183_v20  ;;  %v2194_v32 = vadd.f32 %v5350_v45, %v2193_v31 }
 0x3ec   : > { %v2224_v16 = vadd.f32 %v5392_v58, %v2223_v35  ;;  %v2229_v12 = vand.u32 2147483647, %v5334_v13  ;;  %v2231_v30 = vand.u32 2147483648, %v5334_v13  ;;  %vm2076_vm10 = vweird.f32 %v5205_v62 }
 0x3ed   : > { %v3126_v21 = vpop.eup %3125  ;;  %v2238_v57 = vmul.f32 %v5425_v47, %v2237_v48  ;;  %vm2240_vm2 = vweird.f32 %v5376_v37  ;;  %vm5499_vm5 = vcmp.eq.f32.partialorder %v2244_v28, 8.507059e+37  ;;  %v2218_v31 = vsel %vm5455_vm6, %v2217_v56, %v2213_v25 }
 0x3ee   : > { %v2251_v17 = vmul.f32 %v3126_v21, %v5407_v38  ;;  %vm5508_vm3 = vmor %vm2240_vm2, %vm2241_vm8  ;;  %v2247_v20 = vor.u32 1.1754944e-38, %v2246_v36  ;;  %v2261_v37 = vand.u32 2147483648, %v5407_v38  ;;  %v6115_v28 = vand.u32 2147483647, %v5128_v6 }
 0x3ef   : > { %v2239_v48 = vadd.f32 %v5425_v47, %v2238_v57  ;;  %v2259_v57 = vand.u32 2147483647, %v5407_v38  ;;  %v6118_v24 = vand.u32 2147483647, %v5137_v0  ;;  %vm5531_vm2 = vmor %vm2195_vm11, %vm2196_vm15  ;;  %v2228_v6 = vsel %vm5493_vm7, %v5392_v58, %v2224_v16  ;;  %v6155_v58 = vld [vmem:[#allocation22_spill] sm:$0xff] }
 0x3f0   : > { %v2252_v40 = vsub.f32 1.0, %v2251_v17  ;;  %vm5516_vm13 = vcmp.eq.f32.partialorder %v6115_v28, 8.507059e+37  ;;  %vm2256_vm1 = vweird.f32 %v3126_v21  ;;  %vm2045_vm8 = vweird.f32 %v5142_v10  ;;  %vm5551_vm15 = vmor %vm2165_vm0, %vm2166_vm12 }
 0x3f1   : > { %vm5522_vm6 = vcmp.eq.f32.partialorder %v6118_v24, 8.507059e+37  ;;  %v2243_v0 = vsel %vm5508_vm3, %v5425_v47, %v2239_v48  ;;  %v2198_v28 = vsel %vm5531_vm2, %v5350_v45, %v2194_v32  ;;  %vm2230_vm11 = vcmp.eq.f32.partialorder %v2229_v12, 8.507059e+37 }
 0x3f2   : > { %v2253_v36 = vmul.f32 %v3126_v21, %v2252_v40  ;;  %v2232_v24 = vor.u32 1.1754944e-38, %v2231_v30  ;;  %v2248_v7 = vsel %vm5499_vm5, %v2247_v20, %v2243_v0  ;;  %v2277_v47 = vmul.f32 %v2218_v31, %v5196_v55 }
 0x3f3   : > { %v2279_v16 = vmul.f32 %v2248_v7, %v5249_v34  ;;  %vm2255_vm7 = vweird.f32 %v5407_v38  ;;  %v2168_v45 = vsel %vm5551_vm15, %v5326_v14, %v5442_v15  ;;  %v6125_v32 = vand.u32 2147483648, %v5294_v42  ;;  %v2857_v34 = vld [vmem:[%s5704_s3 + $0x70] sm:$0xff] }
 0x3f4   : > { %v2254_v35 = vadd.f32 %v3126_v21, %v2253_v36  ;;  %v2233_v30 = vsel %vm2230_vm11, %v2232_v24, %v2228_v6  ;;  %vm2257_vm12 = vmor %vm2255_vm7, %vm2256_vm1  ;;  %v2262_v48 = vor.u32 1.1754944e-38, %v2261_v37  ;;  %v2275_v50 = vmul.f32 %v2188_v9, %v5159_v33 }
 0x3f5   : > { %v2202_v12 = vor.u32 1.1754944e-38, %v6125_v32  ;;  %v2296_v40 = vpack.c.bf16 %v2279_v16, %v2277_v47  ;;  %vm2260_vm0 = vcmp.eq.f32.partialorder %v2259_v57, 8.507059e+37  ;;  %vm6126_vm5 = vweird.f32 %v5285_v19  ;;  %v6157_v16 = vld [vmem:[#allocation2_spill] sm:$0xff] }
 0x3f6   : > { %v2258_v55 = vsel %vm2257_vm12, %v3126_v21, %v2254_v35  ;;  %vm6127_vm3 = vweird.f32 %v5208_v44  ;;  %v6130_v14 = vand.u32 2147483647, %v5258_v18  ;;  %v6131_v42 = vand.u32 2147483648, %v5258_v18 }
 0x3f7   : > { %vm5569_vm2 = vmor %vm6127_vm3, %vm6126_vm5  ;;  %v2203_v33 = vsel %vm5476_vm4, %v2202_v12, %v2198_v28  ;;  %v2263_v38 = vsel %vm2260_vm0, %v2262_v48, %v2258_v55  ;;  %vm6132_vm1 = vweird.f32 %v5244_v46  ;;  %vm6133_vm11 = vweird.f32 %v5180_v8  ;;  %2376 = vmatpush.bf16.msra.mxu2 %v2296_v40  ;;  %v2855_v48 = vld [vmem:[%s5704_s3 + $0x60] sm:$0xff] }
 0x3f8   : > { %vm2170_vm15 = vcmp.eq.f32.partialorder %v6130_v14, 8.507059e+37  ;;  %v2172_v15 = vor.u32 1.1754944e-38, %v6131_v42  ;;  %vm5583_vm7 = vmor %vm6133_vm11, %vm6132_vm1  ;;  %v2138_v21 = vsel %vm5569_vm2, %v5285_v19, %v5395_v39  ;;  %v2273_v18 = vmul.f32 %v5435_v53, %v5139_v26  ;;  %v2858_v14 = vld [vmem:[%s5704_s3 + $0x78] sm:$0xff]  ;;  %v2310_v42 = vpop.permute.xlu2 %2309 }
 0x3f9   : > { %v2278_v4 = vmul.f32 %v2233_v30, %v5216_v51  ;;  %v2280_v9 = vmul.f32 %v2263_v38, %v5283_v52  ;;  %v2108_v31 = vsel %vm5583_vm7, %v5244_v46, %v5353_v43  ;;  %v6136_v13 = vand.u32 2147483647, %v5208_v44 }
 0x3fa   : > { %v6137_v20 = vand.u32 2147483648, %v5208_v44  ;;  %v2173_v39 = vsel %vm2170_vm15, %v2172_v15, %v2168_v45  ;;  %v2271_v26 = vmul.f32 %v5388_v59, %v5130_v61  ;;  %v2276_v51 = vmul.f32 %v2203_v33, %v5173_v29  ;;  %v6149_v59 = vld [vmem:[#allocation25_spill] sm:$0xff]  ;;  %v6158_v45 = vld [vmem:[#allocation18_spill] sm:$0xff] }
 0x3fb   : > { %vm2140_vm4 = vcmp.eq.f32.partialorder %v6136_v13, 8.507059e+37  ;;  %v2297_v19 = vpack.c.bf16 %v2280_v9, %v2278_v4  ;;  %v2294_v52 = vpack.c.bf16 %v2275_v50, %v2273_v18  ;;  %v6138_v53 = vsel %vm5222_vm14, %v5146_v60, %v5199_v2  ;;  %v6159_v50 = vld [vmem:[#allocation4_spill] sm:$0xff] }
 0x3fc   : > { %v2142_v57 = vor.u32 1.1754944e-38, %v6137_v20  ;;  %v2038_v46 = vsel %vm5516_vm13, %v5192_v1, %v6138_v53  ;;  %v6139_v44 = vsel %vm5272_vm9, %v5164_v49, %v5254_v23  ;;  %vm6140_vm12 = vweird.f32 %v5161_v22 }
 0x3fd   : > { %v2068_v61 = vsel %vm5522_vm6, %v5229_v63, %v6139_v44  ;;  %vm5626_vm0 = vmor %vm6140_vm12, %vm2076_vm10  ;;  %v6143_v60 = vand.u32 2147483648, %v5180_v8  ;;  %vm6144_vm14 = vweird.f32 %v5169_v3  ;;  %v2269_v63 = vmul.f32 %v5338_v27, %v5122_v41  ;;  %2398 = vmatpush.bf16.msra.mxu3 %v2297_v19  ;;  %2377 = vmatpush.bf16.msra.mxu2 %v2294_v52  ;;  %v6152_v41 = vld [vmem:[#allocation21_spill] sm:$0xff] }
 0x3fe   : > { %v2143_v2 = vsel %vm2140_vm4, %v2142_v57, %v2138_v21  ;;  %vm5636_vm9 = vmor %vm2045_vm8, %vm6144_vm14  ;;  %v2078_v54 = vsel %vm5626_vm0, %v5205_v62, %v5319_v5  ;;  %v6147_v23 = vand.u32 2147483647, %v5180_v8  ;;  %v2274_v43 = vmul.f32 %v2173_v39, %v6148_v11  ;;  %v6153_v8 = vld [vmem:[#allocation26_spill] sm:$0xff] }
 0x3ff   : > { %v2112_v1 = vor.u32 1.1754944e-38, %v6143_v60  ;;  %v2048_v37 = vsel %vm5636_vm9, %v5169_v3, %v6149_v59  ;;  %v6150_v17 = vand.u32 2147483647, %v5161_v22  ;;  %v6151_v62 = vand.u32 2147483648, %v5161_v22 }
 0x400   : > { %vm2110_vm10 = vcmp.eq.f32.partialorder %v6147_v23, 8.507059e+37  ;;  %v2267_v27 = vmul.f32 %v2068_v61, %v6152_v41  ;;  %v2272_v25 = vmul.f32 %v2143_v2, %v6153_v8  ;;  %v2295_v6 = vpack.c.bf16 %v2276_v51, %v2274_v43 }
 0x401   : > { %vm2080_vm13 = vcmp.eq.f32.partialorder %v6150_v17, 8.507059e+37  ;;  %v2082_v5 = vor.u32 1.1754944e-38, %v6151_v62  ;;  %v2113_v56 = vsel %vm2110_vm10, %v2112_v1, %v2108_v31  ;;  %v2292_v0 = vpack.c.bf16 %v2271_v26, %v2269_v63 }
 0x402   : > { %v6154_v36 = vand.u32 2147483648, %v5142_v10  ;;  %v2265_v47 = vmul.f32 %v2038_v46, %v6155_v58  ;;  %v6156_v3 = vand.u32 2147483647, %v5142_v10  ;;  %v2270_v35 = vmul.f32 %v2113_v56, %v6157_v16  ;;  %2399 = vmatpush.bf16.msra.mxu3 %v2295_v6  ;;  %v2856_v10 = vld [vmem:[%s5704_s3 + $0x68] sm:$0xff] }
 0x403   : > { %v2083_v24 = vsel %vm2080_vm13, %v2082_v5, %v2078_v54  ;;  %2378 = vmatpush.bf16.msra.mxu2 %v2292_v0  ;;  %vm6160_vm8 = vcmask 523264   ;;  %v2460_v59 = vlaneseq }
 0x404   : > { %v2052_v28 = vor.u32 1.1754944e-38, %v6154_v36  ;;  %vm2050_vm6 = vcmp.eq.f32.partialorder %v6156_v3, 8.507059e+37  ;;  %v2268_v32 = vmul.f32 %v2083_v24, %v6158_v45  ;;  %v2293_v12 = vpack.c.bf16 %v2272_v25, %v2270_v35  ;;  %vm6161_vm5 = vmmov %vm6160_vm8 }
 0x405   : > { %v2290_v30 = vpack.c.bf16 %v2267_v27, %v2265_v47  ;;  %vm6162_vm3 = vmmov %vm6161_vm5 }
 0x406   : > { %v2053_v22 = vsel %vm2050_vm6, %v2052_v28, %v2048_v37  ;;  %2400 = vmatpush.bf16.msra.mxu3 %v2293_v12  ;;  %vm6163_vm2 = vmmov %vm6162_vm3  ;;  %vm2457_vm6 = vcmask 1040384  }
 0x407   : > { %v2266_v40 = vmul.f32 %v2053_v22, %v6159_v50  ;;  %2379 = vmatpush.bf16.msra.mxu2 %v2290_v30  ;;  %vm6164_vm15 = vmmov %vm6163_vm2 }
 0x408   : > { %vm6165_vm1 = vmmov %vm6163_vm2 }
 0x409   : > { %v2291_v55 = vpack.c.bf16 %v2268_v32, %v2266_v40  ;;  %vm6166_vm11 = vmmov %vm6165_vm1 }
 0x40a   : > { %2811 = vmatmul.msk.bf16.vlgmr.msra.gmra.mxu2 %vm6160_vm8, %v2855_v48  ;;  %vm6167_vm7 = vmmov %vm6165_vm1 }
 0x40b   : > { %2401 = vmatpush.bf16.msra.mxu3 %v2291_v55 }
 0x40e   : > { %2815 = vmatmul.msk.bf16.vlgmr.msra.gmra.mxu3 %vm6161_vm5, %v2855_v48  ;;  %vm2462_vm5 = vcmp.lt.s32.totalorder %v2460_v59, 256 }
 0x41a   : > { %2812 = vmatmul.msk.bf16.gmra.mxu2 %vm6162_vm3, %v2856_v10 }
 0x41e   : > { %2816 = vmatmul.msk.bf16.gmra.mxu3 %vm6163_vm2, %v2856_v10 }
 0x42a   : > { %2813 = vmatmul.msk.bf16.gmra.mxu2 %vm6164_vm15, %v2857_v34 }
 0x42e   : > { %2817 = vmatmul.msk.bf16.gmra.mxu3 %vm6165_vm1, %v2857_v34 }
 0x43a   : > { %2814 = vmatmul.msk.bf16.gmra.mxu2 %vm6166_vm11, %v2858_v14 }
 0x43e   : > { %2818 = vmatmul.msk.bf16.gmra.mxu3 %vm6167_vm7, %v2858_v14 }
 0x48d   : > { %v2381_v15 = vpop.f32.mrf.mxu2 }
 0x48e   : > { %v2382_v33 = vadd.f32 %v2381_v15, %v2310_v42 }
 0x490   : > { %v2819_v38 = vmul.f32 -1.442695, %v2382_v33 }
 0x491   : > { %v2403_v7 = vpop.f32.mrf.mxu3 }
 0x492   : > { %3127 = vpow2.f32 %v2819_v38  ;;  %v2404_v21 = vadd.f32 %v2403_v7, %v2310_v42 }
 0x494   : > { %v2820_v18 = vmul.f32 -1.442695, %v2404_v21 }
 0x495   : > { %v2383_v4 = vpop.f32.mrf.mxu2 }
 0x496   : > { %3129 = vpow2.f32 %v2820_v18 }
 0x498   : > { %v3128_v9 = vpop.eup %3127 }
 0x499   : > { %v2422_v31 = vadd.f32 1.0, %v3128_v9  ;;  %v2405_v13 = vpop.f32.mrf.mxu3 }
 0x49b   : > { %3131 = vrcp.f32 %v2422_v31  ;;  %vm2429_vm0 = vweird.f32 %v2422_v31  ;;  %v2435_v63 = vand.u32 2147483648, %v2422_v31  ;;  %v2433_v11 = vand.u32 2147483647, %v2422_v31 }
 0x49c   : > { %v3130_v20 = vpop.eup %3129 }
 0x49d   : > { %v2423_v57 = vadd.f32 1.0, %v3130_v20  ;;  %v2385_v39 = vpop.f32.mrf.mxu2  ;;  %v2436_v56 = vor.u32 1.1754944e-38, %v2435_v63  ;;  %vm2434_vm8 = vcmp.eq.f32.partialorder %v2433_v11, 8.507059e+37 }
 0x49f   : > { %3133 = vrcp.f32 %v2423_v57  ;;  %v2450_v60 = vand.u32 2147483648, %v2423_v57  ;;  %v2448_v54 = vand.u32 2147483647, %v2423_v57  ;;  %vm2444_vm9 = vweird.f32 %v2423_v57 }
 0x4a1   : > { %v3132_v26 = vpop.eup %3131  ;;  %v2407_v51 = vpop.f32.mrf.mxu3  ;;  %v2451_v37 = vor.u32 1.1754944e-38, %v2450_v60  ;;  %vm2449_vm13 = vcmp.eq.f32.partialorder %v2448_v54, 8.507059e+37 }
 0x4a2   : > { %v2425_v19 = vmul.f32 %v3132_v26, %v2422_v31  ;;  %vm2430_vm4 = vweird.f32 %v3132_v26 }
 0x4a3   : > { %vm5689_vm14 = vmor %vm2429_vm0, %vm2430_vm4 }
 0x4a4   : > { %v2426_v52 = vsub.f32 1.0, %v2425_v19 }
 0x4a5   : > { %v3134_v53 = vpop.eup %3133  ;;  %v2386_v46 = vpop.f32.mrf.mxu2 }
 0x4a6   : > { %v2427_v44 = vmul.f32 %v3132_v26, %v2426_v52  ;;  %v2440_v61 = vmul.f32 %v3134_v53, %v2423_v57  ;;  %vm2445_vm12 = vweird.f32 %v3134_v53 }
 0x4a7   : > { %vm2446_vm10 = vmor %vm2444_vm9, %vm2445_vm12 }
 0x4a8   : > { %v2441_v29 = vsub.f32 1.0, %v2440_v61  ;;  %v2428_v2 = vadd.f32 %v3132_v26, %v2427_v44 }
 0x4a9   : > { %v2408_v1 = vpop.f32.mrf.mxu3 }
 0x4aa   : > { %v2442_v49 = vmul.f32 %v3134_v53, %v2441_v29  ;;  %v2432_v62 = vsel %vm5689_vm14, %v3132_v26, %v2428_v2 }
 0x4ab   : > { %v2437_v8 = vsel %vm2434_vm8, %v2436_v56, %v2432_v62 }
 0x4ac   : > { %v2443_v43 = vadd.f32 %v3134_v53, %v2442_v49 }
 0x4ad   : > { %v2388_v17 = vpop.f32.mrf.mxu2 }
 0x4ae   : > { %v2447_v5 = vsel %vm2446_vm10, %v3134_v53, %v2443_v43 }
 0x4af   : > { %v2452_v41 = vsel %vm2449_vm13, %v2451_v37, %v2447_v5 }
 0x4b0   : > { %v2456_v27 = vrot.slane %v2452_v41, 7 }
 0x4b1   : > { %v2410_v25 = vpop.f32.mrf.mxu3 }
 0x4b2   : > { %v2458_v6 = vsel %vm2457_vm6, %v2437_v8, %v2456_v27 }
 0x4b3   : > { %2464 = vst.msk [vmem:[%s224_s16] sm:$0x3] %vm2462_vm5, %v2458_v6 }
 0x4b5   : > { %v2389_v0 = vpop.f32.mrf.mxu2 }
 0x4b9   : > { %v2411_v36 = vpop.f32.mrf.mxu3 }
 0x4bd   : > { %v2391_v28 = vpop.f32.mrf.mxu2 }
 0x4c1   : > { %v2413_v24 = vpop.f32.mrf.mxu3 }
 0x4c5   : > { %v2392_v58 = vpop.f32.mrf.mxu2 }
 0x4c9   : > { %v2414_v47 = vpop.f32.mrf.mxu3 }
 0x4ca PF: > { %s15_s18 = sadd.s32 1, %s3141_s18  }
 0x4cb   : > { %p12_p5 = scmp.ge.s32.totalorder %s15_s18, 4  }
 0x4cd   :  { %14 = sbr.rel (!%p12_p5) target bundleno = 1 (0x1), region = 76 }

</bundles_post_ra>
